<compile_context>
chip_gen: v5e
topology: v5e:2x2
jax: 0.10.0
libtpu: 0.0.40
codegen_flags: <defaults>
</compile_context>

<pallas_src>
import functools

import jax
import jax.numpy as jnp
from jax import lax
from jax.experimental import pallas as pl
from jax.experimental.pallas import tpu as pltpu


def _fused_kernel(p1_ref, w1_ref, g1_ref, be1_ref,
                  w2_ref, g2_ref, be2_ref, a2_ref,
                  w3_ref, b3_ref, a3_ref,
                  out_ref,
                  xp1_ref, xp2_ref,
                  *, N, H, W):
    """Fused conv1+BN -> conv2+BN+PReLU -> conv3(+bias)+PReLU.

    p1_ref  : (N*H*W, 9*Cin)  bf16  im2col patches of the input
    w*_ref  : (9*Cin_l, Cout_l) bf16 reshaped conv weights
    g*/be*/a*/b3 : (1, C)     f32   BN gamma/beta, PReLU alpha, conv3 bias
    out_ref : (N*H*W, 64)     f32
    xp1_ref : (N, H+2, W+2, 64)  f32 VMEM scratch (padded v1)
    xp2_ref : (N, H+2, W+2, 128) f32 VMEM scratch (padded v2)
    """
    NHW = N * H * W
    f32 = jnp.float32

    def bn_train(acc, gamma, beta):
        # One-pass batch stats over the N*H*W axis (biased variance, eps=1e-5).
        mean = jnp.mean(acc, axis=0, keepdims=True)
        ex2 = jnp.mean(acc * acc, axis=0, keepdims=True)
        var = ex2 - mean * mean
        scale = gamma * lax.rsqrt(var + 1e-5)
        return acc * scale + (beta - mean * scale)

    def prelu(acc, alpha):
        return jnp.where(acc > 0, acc, alpha * acc)

    def im2col(xp_ref, C):
        # tap order (kh, kw) matches the (3,3,Cin,Cout)->(9*Cin,Cout) reshape.
        cols = []
        for kh in range(3):
            for kw in range(3):
                cols.append(xp_ref[:, kh:kh + H, kw:kw + W, :].reshape(NHW, C))
        return jnp.concatenate(cols, axis=-1)

    # ---- layer 1: conv (single im2col matmul) + BN (conv bias cancelled by BN)
    acc1 = jnp.dot(p1_ref[...], w1_ref[...], preferred_element_type=f32)
    v1 = bn_train(acc1, g1_ref[...], be1_ref[...])                # (NHW, 64) f32

    # stash padded v1 in VMEM scratch for the in-kernel im2col of conv2
    xp1_ref[...] = jnp.zeros_like(xp1_ref)
    xp1_ref[:, 1:1 + H, 1:1 + W, :] = v1.reshape(N, H, W, 64)

    # ---- layer 2: conv + BN + PReLU (conv bias cancelled by BN)
    p2 = im2col(xp1_ref, 64).astype(jnp.bfloat16)                 # (NHW, 576)
    acc2 = jnp.dot(p2, w2_ref[...], preferred_element_type=f32)
    v2 = prelu(bn_train(acc2, g2_ref[...], be2_ref[...]), a2_ref[...])  # (NHW,128)

    xp2_ref[...] = jnp.zeros_like(xp2_ref)
    xp2_ref[:, 1:1 + H, 1:1 + W, :] = v2.reshape(N, H, W, 128)

    # ---- layer 3: conv + bias + PReLU (no BN)
    p3 = im2col(xp2_ref, 128).astype(jnp.bfloat16)                # (NHW, 1152)
    acc3 = jnp.dot(p3, w3_ref[...], preferred_element_type=f32) + b3_ref[...]
    out_ref[...] = prelu(acc3, a3_ref[...])                       # (NHW, 64) f32


def init_params(key, in_channel=64):
    def conv_init(k, cin, cout):
        kw_, kb_ = jax.random.split(k)
        bound = 1.0 / jnp.sqrt(cin * 9.0)
        w = jax.random.uniform(kw_, (3, 3, cin, cout), jnp.float32, -bound, bound)
        b = jax.random.uniform(kb_, (cout,), jnp.float32, -bound, bound)
        return w, b

    k1, k2, k3 = jax.random.split(key, 3)
    w1, b1 = conv_init(k1, in_channel, 64)
    w2, b2 = conv_init(k2, 64, 128)
    w3, b3 = conv_init(k3, 128, 64)
    # b1 / b2 are kept for module parity but are unused: BN (training mode)
    # subtracts the per-channel mean, so conv bias cancels exactly.
    return dict(
        w1=w1, b1=b1, g1=jnp.ones((64,), jnp.float32), be1=jnp.zeros((64,), jnp.float32),
        w2=w2, b2=b2, g2=jnp.ones((128,), jnp.float32), be2=jnp.zeros((128,), jnp.float32),
        a2=jnp.full((128,), 0.25, jnp.float32),
        w3=w3, b3=b3, a3=jnp.full((64,), 0.25, jnp.float32),
    )


@jax.jit
def model_forward(params, x_nchw, x_len):
    # TODO(synk): pack_padded_sequence / pad_packed_sequence treated as identity (see header).
    x = jnp.transpose(x_nchw, (0, 2, 3, 1))  # NCHW -> NHWC
    N, H, W, Cin = x.shape
    NHW = N * H * W

    # im2col for conv1 in the wrapper (lane-dense (NHW, 9*Cin) slab, bf16 operands).
    xp = jnp.pad(x, ((0, 0), (1, 1), (1, 1), (0, 0)))
    cols = [xp[:, kh:kh + H, kw:kw + W, :] for kh in range(3) for kw in range(3)]
    p1 = jnp.concatenate(cols, axis=-1).reshape(NHW, 9 * Cin).astype(jnp.bfloat16)

    w1 = params['w1'].reshape(9 * Cin, 64).astype(jnp.bfloat16)
    w2 = params['w2'].reshape(9 * 64, 128).astype(jnp.bfloat16)
    w3 = params['w3'].reshape(9 * 128, 64).astype(jnp.bfloat16)

    def row(v):
        return v.reshape(1, -1).astype(jnp.float32)

    kernel = functools.partial(_fused_kernel, N=N, H=H, W=W)
    vm = pl.BlockSpec(memory_space=pltpu.MemorySpace.VMEM)
    out = pl.pallas_call(
        kernel,
        out_shape=jax.ShapeDtypeStruct((NHW, 64), jnp.float32),
        in_specs=[vm] * 11,
        out_specs=vm,
        scratch_shapes=[
            pltpu.VMEM((N, H + 2, W + 2, 64), jnp.float32),
            pltpu.VMEM((N, H + 2, W + 2, 128), jnp.float32),
        ],
    )(p1, w1, row(params['g1']), row(params['be1']),
      w2, row(params['g2']), row(params['be2']), row(params['a2']),
      w3, row(params['b3']), row(params['a3']))

    v3 = jnp.transpose(out.reshape(N, H, W, 64), (0, 3, 1, 2))  # -> NCHW

    # out_len = max_pool2d(interpolate(x_len.view(1,1,L,1), scale_factor=2),
    #                      kernel_size=v3.shape[-1]).squeeze().long()
    L = x_len.shape[0]
    t = x_len.astype(jnp.float32).reshape(1, 1, L, 1)
    t = jnp.repeat(jnp.repeat(t, 2, axis=2), 2, axis=3)   # nearest upsample, scale 2
    k = v3.shape[-1]
    pooled = lax.reduce_window(t, -jnp.inf, lax.max,
                               (1, 1, k, k), (1, 1, k, k), 'VALID')
    out_len = jnp.squeeze(pooled).astype(jnp.int32)  # torch .long(); int32 since x64 is off
    return v3, out_len


if __name__ == "__main__":
    key = jax.random.PRNGKey(0)
    k_param, k_x = jax.random.split(key)

    # Small shapes consistent with the module: N=2, C=in_channel=64, H=8, W=2.
    # (W=2 keeps the original max_pool2d(kernel_size=W) step well-defined.)
    N, C, H, W = 2, 64, 8, 2
    x = jax.random.normal(k_x, (N, C, H, W), jnp.float32)
    x_len = jnp.array([8, 6], jnp.int32)

    params = init_params(k_param, in_channel=C)
    v3, out_len = model_forward(params, x, x_len)
    jax.block_until_ready((v3, out_len))

    assert v3.shape == (N, 64, H, W), v3.shape
    assert out_len.shape == (N,), out_len.shape
    print("KERNEL_OK")
</pallas_src>

<mosaic_0001>
module attributes {stable_mosaic.version = 11 : i64} {
  func.func @_fused_kernel(%arg0: memref<32x576xbf16, #tpu.memory_space<vmem>>, %arg1: memref<576x64xbf16, #tpu.memory_space<vmem>>, %arg2: memref<1x64xf32, #tpu.memory_space<vmem>>, %arg3: memref<1x64xf32, #tpu.memory_space<vmem>>, %arg4: memref<576x128xbf16, #tpu.memory_space<vmem>>, %arg5: memref<1x128xf32, #tpu.memory_space<vmem>>, %arg6: memref<1x128xf32, #tpu.memory_space<vmem>>, %arg7: memref<1x128xf32, #tpu.memory_space<vmem>>, %arg8: memref<1152x64xbf16, #tpu.memory_space<vmem>>, %arg9: memref<1x64xf32, #tpu.memory_space<vmem>>, %arg10: memref<1x64xf32, #tpu.memory_space<vmem>>, %arg11: memref<32x64xf32, #tpu.memory_space<vmem>>, %arg12: memref<2x10x4x64xf32, #tpu.memory_space<vmem>>, %arg13: memref<2x10x4x128xf32, #tpu.memory_space<vmem>>) attributes {dimension_semantics = [], scalar_prefetch = 0 : i64, scratch_operands = 2 : i64, tpu.core_type = #tpu.core_type<tc>} {
    %c0 = arith.constant 0 : index
    %c0_0 = arith.constant 0 : index
    %0 = vector.load %arg0[%c0, %c0_0] : memref<32x576xbf16, #tpu.memory_space<vmem>>, vector<32x576xbf16>
    %c0_1 = arith.constant 0 : index
    %c0_2 = arith.constant 0 : index
    %1 = vector.load %arg1[%c0_1, %c0_2] : memref<576x64xbf16, #tpu.memory_space<vmem>>, vector<576x64xbf16>
    %cst = arith.constant dense<0.000000e+00> : vector<32x64xf32>
    %2 = tpu.matmul %0, %1, %cst {dimension_numbers = #tpu.dot_dimension_numbers<[1], [0], [0], [1], [0, 0, 1, 1], [], []>} : vector<32x576xbf16>, vector<576x64xbf16>, vector<32x64xf32> -> vector<32x64xf32>
    %c0_3 = arith.constant 0 : index
    %c0_4 = arith.constant 0 : index
    %3 = vector.load %arg2[%c0_3, %c0_4] : memref<1x64xf32, #tpu.memory_space<vmem>>, vector<1x64xf32>
    %c0_5 = arith.constant 0 : index
    %c0_6 = arith.constant 0 : index
    %4 = vector.load %arg3[%c0_5, %c0_6] : memref<1x64xf32, #tpu.memory_space<vmem>>, vector<1x64xf32>
    %cst_7 = arith.constant dense<0.000000e+00> : vector<64xf32>
    %5 = vector.multi_reduction <add>, %2, %cst_7 [0] : vector<32x64xf32> to vector<64xf32>
    %6 = vector.shape_cast %5 : vector<64xf32> to vector<1x64xf32>
    %cst_8 = arith.constant 3.200000e+01 : f32
    %7 = vector.broadcast %cst_8 : f32 to vector<1x64xf32>
    %8 = arith.divf %6, %7 : vector<1x64xf32>
    %9 = arith.mulf %2, %2 : vector<32x64xf32>
    %cst_9 = arith.constant dense<0.000000e+00> : vector<64xf32>
    %10 = vector.multi_reduction <add>, %9, %cst_9 [0] : vector<32x64xf32> to vector<64xf32>
    %11 = vector.shape_cast %10 : vector<64xf32> to vector<1x64xf32>
    %cst_10 = arith.constant 3.200000e+01 : f32
    %12 = vector.broadcast %cst_10 : f32 to vector<1x64xf32>
    %13 = arith.divf %11, %12 : vector<1x64xf32>
    %14 = arith.mulf %8, %8 : vector<1x64xf32>
    %15 = arith.subf %13, %14 : vector<1x64xf32>
    %cst_11 = arith.constant 9.99999974E-6 : f32
    %16 = vector.broadcast %cst_11 : f32 to vector<1x64xf32>
    %17 = arith.addf %15, %16 : vector<1x64xf32>
    %18 = math.rsqrt %17 : vector<1x64xf32>
    %19 = arith.mulf %3, %18 : vector<1x64xf32>
    %20 = vector.broadcast %19 : vector<1x64xf32> to vector<32x64xf32>
    %21 = arith.mulf %2, %20 : vector<32x64xf32>
    %22 = arith.mulf %8, %19 : vector<1x64xf32>
    %23 = arith.subf %4, %22 : vector<1x64xf32>
    %24 = vector.broadcast %23 : vector<1x64xf32> to vector<32x64xf32>
    %25 = arith.addf %21, %24 : vector<32x64xf32>
    %cst_12 = arith.constant 0.000000e+00 : f32
    %26 = vector.broadcast %cst_12 : f32 to vector<2x10x4x64xf32>
    %c0_13 = arith.constant 0 : index
    %c0_14 = arith.constant 0 : index
    %c0_15 = arith.constant 0 : index
    %c0_16 = arith.constant 0 : index
    %27 = vector.load %arg12[%c0_13, %c0_14, %c0_15, %c0_16] : memref<2x10x4x64xf32, #tpu.memory_space<vmem>>, vector<2x10x4x64xf32>
    tpu.vector_store %arg12[%c0_13, %c0_14, %c0_15, %c0_16], %26 {strides = array<i32>} : memref<2x10x4x64xf32, #tpu.memory_space<vmem>>, vector<2x10x4x64xf32>,
    %28 = vector.shape_cast %25 : vector<32x64xf32> to vector<2x8x2x64xf32>
    %c0_17 = arith.constant 0 : index
    %c1 = arith.constant 1 : index
    %c1_18 = arith.constant 1 : index
    %c0_19 = arith.constant 0 : index
    %29 = vector.load %arg12[%c0_17, %c1, %c1_18, %c0_19] : memref<2x10x4x64xf32, #tpu.memory_space<vmem>>, vector<2x8x2x64xf32>
    tpu.vector_store %arg12[%c0_17, %c1, %c1_18, %c0_19], %28 {strides = array<i32>} : memref<2x10x4x64xf32, #tpu.memory_space<vmem>>, vector<2x8x2x64xf32>,
    %c0_20 = arith.constant 0 : index
    %c0_21 = arith.constant 0 : index
    %c0_22 = arith.constant 0 : index
    %c0_23 = arith.constant 0 : index
    %30 = vector.load %arg12[%c0_20, %c0_21, %c0_22, %c0_23] : memref<2x10x4x64xf32, #tpu.memory_space<vmem>>, vector<2x8x2x64xf32>
    %31 = vector.shape_cast %30 : vector<2x8x2x64xf32> to vector<32x64xf32>
    %c0_24 = arith.constant 0 : index
    %c0_25 = arith.constant 0 : index
    %c1_26 = arith.constant 1 : index
    %c0_27 = arith.constant 0 : index
    %32 = vector.load %arg12[%c0_24, %c0_25, %c1_26, %c0_27] : memref<2x10x4x64xf32, #tpu.memory_space<vmem>>, vector<2x8x2x64xf32>
    %33 = vector.shape_cast %32 : vector<2x8x2x64xf32> to vector<32x64xf32>
    %c0_28 = arith.constant 0 : index
    %c0_29 = arith.constant 0 : index
    %c2 = arith.constant 2 : index
    %c0_30 = arith.constant 0 : index
    %34 = vector.load %arg12[%c0_28, %c0_29, %c2, %c0_30] : memref<2x10x4x64xf32, #tpu.memory_space<vmem>>, vector<2x8x2x64xf32>
    %35 = vector.shape_cast %34 : vector<2x8x2x64xf32> to vector<32x64xf32>
    %c0_31 = arith.constant 0 : index
    %c1_32 = arith.constant 1 : index
    %c0_33 = arith.constant 0 : index
    %c0_34 = arith.constant 0 : index
    %36 = vector.load %arg12[%c0_31, %c1_32, %c0_33, %c0_34] : memref<2x10x4x64xf32, #tpu.memory_space<vmem>>, vector<2x8x2x64xf32>
    %37 = vector.shape_cast %36 : vector<2x8x2x64xf32> to vector<32x64xf32>
    %c0_35 = arith.constant 0 : index
    %c1_36 = arith.constant 1 : index
    %c1_37 = arith.constant 1 : index
    %c0_38 = arith.constant 0 : index
    %38 = vector.load %arg12[%c0_35, %c1_36, %c1_37, %c0_38] : memref<2x10x4x64xf32, #tpu.memory_space<vmem>>, vector<2x8x2x64xf32>
    %39 = vector.shape_cast %38 : vector<2x8x2x64xf32> to vector<32x64xf32>
    %c0_39 = arith.constant 0 : index
    %c1_40 = arith.constant 1 : index
    %c2_41 = arith.constant 2 : index
    %c0_42 = arith.constant 0 : index
    %40 = vector.load %arg12[%c0_39, %c1_40, %c2_41, %c0_42] : memref<2x10x4x64xf32, #tpu.memory_space<vmem>>, vector<2x8x2x64xf32>
    %41 = vector.shape_cast %40 : vector<2x8x2x64xf32> to vector<32x64xf32>
    %c0_43 = arith.constant 0 : index
    %c2_44 = arith.constant 2 : index
    %c0_45 = arith.constant 0 : index
    %c0_46 = arith.constant 0 : index
    %42 = vector.load %arg12[%c0_43, %c2_44, %c0_45, %c0_46] : memref<2x10x4x64xf32, #tpu.memory_space<vmem>>, vector<2x8x2x64xf32>
    %43 = vector.shape_cast %42 : vector<2x8x2x64xf32> to vector<32x64xf32>
    %c0_47 = arith.constant 0 : index
    %c2_48 = arith.constant 2 : index
    %c1_49 = arith.constant 1 : index
    %c0_50 = arith.constant 0 : index
    %44 = vector.load %arg12[%c0_47, %c2_48, %c1_49, %c0_50] : memref<2x10x4x64xf32, #tpu.memory_space<vmem>>, vector<2x8x2x64xf32>
    %45 = vector.shape_cast %44 : vector<2x8x2x64xf32> to vector<32x64xf32>
    %c0_51 = arith.constant 0 : index
    %c2_52 = arith.constant 2 : index
    %c2_53 = arith.constant 2 : index
    %c0_54 = arith.constant 0 : index
    %46 = vector.load %arg12[%c0_51, %c2_52, %c2_53, %c0_54] : memref<2x10x4x64xf32, #tpu.memory_space<vmem>>, vector<2x8x2x64xf32>
    %47 = vector.shape_cast %46 : vector<2x8x2x64xf32> to vector<32x64xf32>
    %48 = tpu.concatenate %31, %33, %35, %37, %39, %41, %43, %45, %47 in 1 : vector<32x64xf32>, vector<32x64xf32>, vector<32x64xf32>, vector<32x64xf32>, vector<32x64xf32>, vector<32x64xf32>, vector<32x64xf32>, vector<32x64xf32>, vector<32x64xf32> -> vector<32x576xf32>
    %49 = arith.truncf %48 : vector<32x576xf32> to vector<32x576xbf16>
    %c0_55 = arith.constant 0 : index
    %c0_56 = arith.constant 0 : index
    %50 = vector.load %arg4[%c0_55, %c0_56] : memref<576x128xbf16, #tpu.memory_space<vmem>>, vector<576x128xbf16>
    %cst_57 = arith.constant dense<0.000000e+00> : vector<32x128xf32>
    %51 = tpu.matmul %49, %50, %cst_57 {dimension_numbers = #tpu.dot_dimension_numbers<[1], [0], [0], [1], [0, 0, 1, 1], [], []>} : vector<32x576xbf16>, vector<576x128xbf16>, vector<32x128xf32> -> vector<32x128xf32>
    %c0_58 = arith.constant 0 : index
    %c0_59 = arith.constant 0 : index
    %52 = vector.load %arg5[%c0_58, %c0_59] : memref<1x128xf32, #tpu.memory_space<vmem>>, vector<1x128xf32>
    %c0_60 = arith.constant 0 : index
    %c0_61 = arith.constant 0 : index
    %53 = vector.load %arg6[%c0_60, %c0_61] : memref<1x128xf32, #tpu.memory_space<vmem>>, vector<1x128xf32>
    %cst_62 = arith.constant dense<0.000000e+00> : vector<128xf32>
    %54 = vector.multi_reduction <add>, %51, %cst_62 [0] : vector<32x128xf32> to vector<128xf32>
    %55 = vector.shape_cast %54 : vector<128xf32> to vector<1x128xf32>
    %cst_63 = arith.constant 3.200000e+01 : f32
    %56 = vector.broadcast %cst_63 : f32 to vector<1x128xf32>
    %57 = arith.divf %55, %56 : vector<1x128xf32>
    %58 = arith.mulf %51, %51 : vector<32x128xf32>
    %cst_64 = arith.constant dense<0.000000e+00> : vector<128xf32>
    %59 = vector.multi_reduction <add>, %58, %cst_64 [0] : vector<32x128xf32> to vector<128xf32>
    %60 = vector.shape_cast %59 : vector<128xf32> to vector<1x128xf32>
    %cst_65 = arith.constant 3.200000e+01 : f32
    %61 = vector.broadcast %cst_65 : f32 to vector<1x128xf32>
    %62 = arith.divf %60, %61 : vector<1x128xf32>
    %63 = arith.mulf %57, %57 : vector<1x128xf32>
    %64 = arith.subf %62, %63 : vector<1x128xf32>
    %cst_66 = arith.constant 9.99999974E-6 : f32
    %65 = vector.broadcast %cst_66 : f32 to vector<1x128xf32>
    %66 = arith.addf %64, %65 : vector<1x128xf32>
    %67 = math.rsqrt %66 : vector<1x128xf32>
    %68 = arith.mulf %52, %67 : vector<1x128xf32>
    %69 = vector.broadcast %68 : vector<1x128xf32> to vector<32x128xf32>
    %70 = arith.mulf %51, %69 : vector<32x128xf32>
    %71 = arith.mulf %57, %68 : vector<1x128xf32>
    %72 = arith.subf %53, %71 : vector<1x128xf32>
    %73 = vector.broadcast %72 : vector<1x128xf32> to vector<32x128xf32>
    %74 = arith.addf %70, %73 : vector<32x128xf32>
    %c0_67 = arith.constant 0 : index
    %c0_68 = arith.constant 0 : index
    %75 = vector.load %arg7[%c0_67, %c0_68] : memref<1x128xf32, #tpu.memory_space<vmem>>, vector<1x128xf32>
    %cst_69 = arith.constant 0.000000e+00 : f32
    %76 = vector.broadcast %cst_69 : f32 to vector<32x128xf32>
    %77 = arith.cmpf ogt, %74, %76 : vector<32x128xf32>
    %78 = vector.broadcast %75 : vector<1x128xf32> to vector<32x128xf32>
    %79 = arith.mulf %78, %74 : vector<32x128xf32>
    %80 = arith.select %77, %74, %79 : vector<32x128xi1>, vector<32x128xf32>
    %cst_70 = arith.constant 0.000000e+00 : f32
    %81 = vector.broadcast %cst_70 : f32 to vector<2x10x4x128xf32>
    %c0_71 = arith.constant 0 : index
    %c0_72 = arith.constant 0 : index
    %c0_73 = arith.constant 0 : index
    %c0_74 = arith.constant 0 : index
    %82 = vector.load %arg13[%c0_71, %c0_72, %c0_73, %c0_74] : memref<2x10x4x128xf32, #tpu.memory_space<vmem>>, vector<2x10x4x128xf32>
    tpu.vector_store %arg13[%c0_71, %c0_72, %c0_73, %c0_74], %81 {strides = array<i32>} : memref<2x10x4x128xf32, #tpu.memory_space<vmem>>, vector<2x10x4x128xf32>,
    %83 = vector.shape_cast %80 : vector<32x128xf32> to vector<2x8x2x128xf32>
    %c0_75 = arith.constant 0 : index
    %c1_76 = arith.constant 1 : index
    %c1_77 = arith.constant 1 : index
    %c0_78 = arith.constant 0 : index
    %84 = vector.load %arg13[%c0_75, %c1_76, %c1_77, %c0_78] : memref<2x10x4x128xf32, #tpu.memory_space<vmem>>, vector<2x8x2x128xf32>
    tpu.vector_store %arg13[%c0_75, %c1_76, %c1_77, %c0_78], %83 {strides = array<i32>} : memref<2x10x4x128xf32, #tpu.memory_space<vmem>>, vector<2x8x2x128xf32>,
    %c0_79 = arith.constant 0 : index
    %c0_80 = arith.constant 0 : index
    %c0_81 = arith.constant 0 : index
    %c0_82 = arith.constant 0 : index
    %85 = vector.load %arg13[%c0_79, %c0_80, %c0_81, %c0_82] : memref<2x10x4x128xf32, #tpu.memory_space<vmem>>, vector<2x8x2x128xf32>
    %86 = vector.shape_cast %85 : vector<2x8x2x128xf32> to vector<32x128xf32>
    %c0_83 = arith.constant 0 : index
    %c0_84 = arith.constant 0 : index
    %c1_85 = arith.constant 1 : index
    %c0_86 = arith.constant 0 : index
    %87 = vector.load %arg13[%c0_83, %c0_84, %c1_85, %c0_86] : memref<2x10x4x128xf32, #tpu.memory_space<vmem>>, vector<2x8x2x128xf32>
    %88 = vector.shape_cast %87 : vector<2x8x2x128xf32> to vector<32x128xf32>
    %c0_87 = arith.constant 0 : index
    %c0_88 = arith.constant 0 : index
    %c2_89 = arith.constant 2 : index
    %c0_90 = arith.constant 0 : index
    %89 = vector.load %arg13[%c0_87, %c0_88, %c2_89, %c0_90] : memref<2x10x4x128xf32, #tpu.memory_space<vmem>>, vector<2x8x2x128xf32>
    %90 = vector.shape_cast %89 : vector<2x8x2x128xf32> to vector<32x128xf32>
    %c0_91 = arith.constant 0 : index
    %c1_92 = arith.constant 1 : index
    %c0_93 = arith.constant 0 : index
    %c0_94 = arith.constant 0 : index
    %91 = vector.load %arg13[%c0_91, %c1_92, %c0_93, %c0_94] : memref<2x10x4x128xf32, #tpu.memory_space<vmem>>, vector<2x8x2x128xf32>
    %92 = vector.shape_cast %91 : vector<2x8x2x128xf32> to vector<32x128xf32>
    %c0_95 = arith.constant 0 : index
    %c1_96 = arith.constant 1 : index
    %c1_97 = arith.constant 1 : index
    %c0_98 = arith.constant 0 : index
    %93 = vector.load %arg13[%c0_95, %c1_96, %c1_97, %c0_98] : memref<2x10x4x128xf32, #tpu.memory_space<vmem>>, vector<2x8x2x128xf32>
    %94 = vector.shape_cast %93 : vector<2x8x2x128xf32> to vector<32x128xf32>
    %c0_99 = arith.constant 0 : index
    %c1_100 = arith.constant 1 : index
    %c2_101 = arith.constant 2 : index
    %c0_102 = arith.constant 0 : index
    %95 = vector.load %arg13[%c0_99, %c1_100, %c2_101, %c0_102] : memref<2x10x4x128xf32, #tpu.memory_space<vmem>>, vector<2x8x2x128xf32>
    %96 = vector.shape_cast %95 : vector<2x8x2x128xf32> to vector<32x128xf32>
    %c0_103 = arith.constant 0 : index
    %c2_104 = arith.constant 2 : index
    %c0_105 = arith.constant 0 : index
    %c0_106 = arith.constant 0 : index
    %97 = vector.load %arg13[%c0_103, %c2_104, %c0_105, %c0_106] : memref<2x10x4x128xf32, #tpu.memory_space<vmem>>, vector<2x8x2x128xf32>
    %98 = vector.shape_cast %97 : vector<2x8x2x128xf32> to vector<32x128xf32>
    %c0_107 = arith.constant 0 : index
    %c2_108 = arith.constant 2 : index
    %c1_109 = arith.constant 1 : index
    %c0_110 = arith.constant 0 : index
    %99 = vector.load %arg13[%c0_107, %c2_108, %c1_109, %c0_110] : memref<2x10x4x128xf32, #tpu.memory_space<vmem>>, vector<2x8x2x128xf32>
    %100 = vector.shape_cast %99 : vector<2x8x2x128xf32> to vector<32x128xf32>
    %c0_111 = arith.constant 0 : index
    %c2_112 = arith.constant 2 : index
    %c2_113 = arith.constant 2 : index
    %c0_114 = arith.constant 0 : index
    %101 = vector.load %arg13[%c0_111, %c2_112, %c2_113, %c0_114] : memref<2x10x4x128xf32, #tpu.memory_space<vmem>>, vector<2x8x2x128xf32>
    %102 = vector.shape_cast %101 : vector<2x8x2x128xf32> to vector<32x128xf32>
    %103 = tpu.concatenate %86, %88, %90, %92, %94, %96, %98, %100, %102 in 1 : vector<32x128xf32>, vector<32x128xf32>, vector<32x128xf32>, vector<32x128xf32>, vector<32x128xf32>, vector<32x128xf32>, vector<32x128xf32>, vector<32x128xf32>, vector<32x128xf32> -> vector<32x1152xf32>
    %104 = arith.truncf %103 : vector<32x1152xf32> to vector<32x1152xbf16>
    %c0_115 = arith.constant 0 : index
    %c0_116 = arith.constant 0 : index
    %105 = vector.load %arg8[%c0_115, %c0_116] : memref<1152x64xbf16, #tpu.memory_space<vmem>>, vector<1152x64xbf16>
    %cst_117 = arith.constant dense<0.000000e+00> : vector<32x64xf32>
    %106 = tpu.matmul %104, %105, %cst_117 {dimension_numbers = #tpu.dot_dimension_numbers<[1], [0], [0], [1], [0, 0, 1, 1], [], []>} : vector<32x1152xbf16>, vector<1152x64xbf16>, vector<32x64xf32> -> vector<32x64xf32>
    %c0_118 = arith.constant 0 : index
    %c0_119 = arith.constant 0 : index
    %107 = vector.load %arg9[%c0_118, %c0_119] : memref<1x64xf32, #tpu.memory_space<vmem>>, vector<1x64xf32>
    %108 = vector.broadcast %107 : vector<1x64xf32> to vector<32x64xf32>
    %109 = arith.addf %106, %108 : vector<32x64xf32>
    %c0_120 = arith.constant 0 : index
    %c0_121 = arith.constant 0 : index
    %110 = vector.load %arg10[%c0_120, %c0_121] : memref<1x64xf32, #tpu.memory_space<vmem>>, vector<1x64xf32>
    %cst_122 = arith.constant 0.000000e+00 : f32
    %111 = vector.broadcast %cst_122 : f32 to vector<32x64xf32>
    %112 = arith.cmpf ogt, %109, %111 : vector<32x64xf32>
    %113 = vector.broadcast %110 : vector<1x64xf32> to vector<32x64xf32>
    %114 = arith.mulf %113, %109 : vector<32x64xf32>
    %115 = arith.select %112, %109, %114 : vector<32x64xi1>, vector<32x64xf32>
    %c0_123 = arith.constant 0 : index
    %c0_124 = arith.constant 0 : index
    %116 = vector.load %arg11[%c0_123, %c0_124] : memref<32x64xf32, #tpu.memory_space<vmem>>, vector<32x64xf32>
    tpu.vector_store %arg11[%c0_123, %c0_124], %115 {strides = array<i32>} : memref<32x64xf32, #tpu.memory_space<vmem>>, vector<32x64xf32>,
    return
  }
}

</mosaic_0001>

<bundles_post_ra>
// kernel: model_forward.1
= control target key start
LH: loop header
LB: loop body
LE: loop exit
PB: predicated region body
PF: predicated region fallthrough
CT: control target
= control target key end

     0   :  { %s4814_s0 = inlined_call_operand.vmem [shape: bf16[32,576], index: 0, kind: input, shape index: {}]   ;;  %s4815_s1 = inlined_call_operand.vmem [shape: bf16[576,64], index: 1, kind: input, shape index: {}]   ;;  %s4816_s2 = inlined_call_operand.vmem [shape: f32[1,64], index: 2, kind: input, shape index: {}]   ;;  %s4817_s3 = inlined_call_operand.vmem [shape: f32[1,64], index: 3, kind: input, shape index: {}]   ;;  %s4818_s4 = inlined_call_operand.vmem [shape: bf16[576,128], index: 4, kind: input, shape index: {}]   ;;  %s4819_s5 = inlined_call_operand.vmem [shape: f32[1,128], index: 5, kind: input, shape index: {}]   ;;  %s4820_s6 = inlined_call_operand.vmem [shape: f32[1,128], index: 6, kind: input, shape index: {}]   ;;  %s4821_s7 = inlined_call_operand.vmem [shape: f32[1,128], index: 7, kind: input, shape index: {}]   ;;  %s4822_s8 = inlined_call_operand.vmem [shape: bf16[1152,64], index: 8, kind: input, shape index: {}]   ;;  %s4823_s9 = inlined_call_operand.vmem [shape: f32[1,64], index: 9, kind: input, shape index: {}]   ;;  %s4824_s10 = inlined_call_operand.vmem [shape: f32[1,64], index: 10, kind: input, shape index: {}]   ;;  %s4825_s11 = inlined_call_operand.hbm [shape: f32[32,64], index: 11, kind: output, shape index: {}]  }
   0x1   :  { %v3794_v0 = vld [vmem:[%s4815_s1 + $0x38] sm:$0xff]  ;;  %v3793_v4 = vld [vmem:[%s4815_s1 + $0x30] sm:$0xff]  ;;  %v3792_v8 = vld [vmem:[%s4815_s1 + $0x28] sm:$0xff] }
   0x2   :  { %v3802_v1 = vld [vmem:[%s4815_s1 + $0x78] sm:$0xff]  ;;  %397 = vmatpush.bf16.msra.mxu0 %v3794_v0  ;;  %v3801_v5 = vld [vmem:[%s4815_s1 + $0x70] sm:$0xff]  ;;  %v3800_v9 = vld [vmem:[%s4815_s1 + $0x68] sm:$0xff] }
   0x3   :  { %v3810_v2 = vld [vmem:[%s4815_s1 + $0xb8] sm:$0xff]  ;;  %416 = vmatpush.bf16.msra.mxu1 %v3802_v1  ;;  %v3809_v6 = vld [vmem:[%s4815_s1 + $0xb0] sm:$0xff]  ;;  %v3808_v10 = vld [vmem:[%s4815_s1 + $0xa8] sm:$0xff] }
   0x4   :  { %v3818_v3 = vld [vmem:[%s4815_s1 + $0xf8] sm:$0xff]  ;;  %435 = vmatpush.bf16.msra.mxu2 %v3810_v2  ;;  %v3817_v7 = vld [vmem:[%s4815_s1 + $0xf0] sm:$0xff]  ;;  %v3816_v11 = vld [vmem:[%s4815_s1 + $0xe8] sm:$0xff] }
   0x5   :  { %454 = vmatpush.bf16.msra.mxu3 %v3818_v3  ;;  %v3791_v12 = vld [vmem:[%s4815_s1 + $0x20] sm:$0xff]  ;;  %v3790_v16 = vld [vmem:[%s4815_s1 + $0x18] sm:$0xff] }
   0x6   :  { %398 = vmatpush.bf16.msra.mxu0 %v3793_v4  ;;  %v3799_v13 = vld [vmem:[%s4815_s1 + $0x60] sm:$0xff]  ;;  %v3798_v17 = vld [vmem:[%s4815_s1 + $0x58] sm:$0xff] }
   0x7   :  { %417 = vmatpush.bf16.msra.mxu1 %v3801_v5  ;;  %v3807_v14 = vld [vmem:[%s4815_s1 + $0xa0] sm:$0xff]  ;;  %v3806_v18 = vld [vmem:[%s4815_s1 + $0x98] sm:$0xff] }
   0x8   :  { %436 = vmatpush.bf16.msra.mxu2 %v3809_v6  ;;  %v3815_v15 = vld [vmem:[%s4815_s1 + $0xe0] sm:$0xff]  ;;  %v3814_v19 = vld [vmem:[%s4815_s1 + $0xd8] sm:$0xff] }
   0x9   :  { %455 = vmatpush.bf16.msra.mxu3 %v3817_v7 }
   0xa   :  { %399 = vmatpush.bf16.msra.mxu0 %v3792_v8 }
   0xb   :  { %418 = vmatpush.bf16.msra.mxu1 %v3800_v9 }
   0xc   :  { %437 = vmatpush.bf16.msra.mxu2 %v3808_v10 }
   0xd   :  { %456 = vmatpush.bf16.msra.mxu3 %v3816_v11 }
   0xe   :  { %400 = vmatpush.bf16.msra.mxu0 %v3791_v12 }
   0xf   :  { %419 = vmatpush.bf16.msra.mxu1 %v3799_v13 }
  0x10   :  { %438 = vmatpush.bf16.msra.mxu2 %v3807_v14 }
  0x11   :  { %457 = vmatpush.bf16.msra.mxu3 %v3815_v15 }
  0x12   :  { %16 = vsyncpa [#allocation5], 0  ;;  %401 = vmatpush.bf16.msra.mxu0 %v3790_v16  ;;  %v3789_v20 = vld [vmem:[%s4815_s1 + $0x10] sm:$0xff]  ;;  %v3788_v24 = vld [vmem:[%s4815_s1 + $0x8] sm:$0xff]  ;;  %vm390_vm0 = vcmask 523264   ;;  %vm563_vm2 = vcmask 519168  }
  0x13   :  { %420 = vmatpush.bf16.msra.mxu1 %v3798_v17  ;;  %v3797_v21 = vld [vmem:[%s4815_s1 + $0x50] sm:$0xff]  ;;  %v3796_v25 = vld [vmem:[%s4815_s1 + $0x48] sm:$0xff]  ;;  %v3787_v28 = vld [vmem:[%s4815_s1] sm:$0xff]  ;;  %vm613_vm6 = vcmask 517120   ;;  %s3145_s14 = sshll.u32 %s4825_s11, 4  ;;  %s4024_s15 = smov 128   ;;  %s3146_s14 = int_to_ptr.hbm [resolvable:$true] %s3145_s14 }
  0x14   :  { %439 = vmatpush.bf16.msra.mxu2 %v3806_v18  ;;  %v3805_v22 = vld [vmem:[%s4815_s1 + $0x90] sm:$0xff]  ;;  %v3804_v26 = vld [vmem:[%s4815_s1 + $0x88] sm:$0xff]  ;;  %v3795_v29 = vld [vmem:[%s4815_s1 + $0x40] sm:$0xff]  ;;  %s4025_s16 = smov 8  }
  0x15   :  { %458 = vmatpush.bf16.msra.mxu3 %v3814_v19  ;;  %v3813_v23 = vld [vmem:[%s4815_s1 + $0xd0] sm:$0xff]  ;;  %v3812_v27 = vld [vmem:[%s4815_s1 + $0xc8] sm:$0xff]  ;;  %v3803_v30 = vld [vmem:[%s4815_s1 + $0x80] sm:$0xff] }
  0x16   :  { %402 = vmatpush.bf16.msra.mxu0 %v3789_v20  ;;  %v3811_v31 = vld [vmem:[%s4815_s1 + $0xc0] sm:$0xff]  ;;  %v3779_v33 = vld [vmem:[%s4814_s0 + $0x10] sm:$0xf0]  ;;  %v3161_v35 = vld [vmem:[%s4814_s0 + $0x14] sm:$0xf0] }
  0x17   :  { %421 = vmatpush.bf16.msra.mxu1 %v3797_v21  ;;  %v3159_v32 = vld [vmem:[%s4814_s0] sm:$0xf]  ;;  %v3777_v34 = vld [vmem:[%s4814_s0 + $0x4] sm:$0xf]  ;;  %v3167_v36 = vld [vmem:[%s4814_s0 + $0x8] sm:$0xf] }
  0x18   :  { %440 = vmatpush.bf16.msra.mxu2 %v3805_v22  ;;  %v3780_v37 = vld [vmem:[%s4814_s0 + $0x18] sm:$0xf0]  ;;  %v3778_v38 = vld [vmem:[%s4814_s0 + $0xc] sm:$0xf]  ;;  %v3169_v39 = vld [vmem:[%s4814_s0 + $0x1c] sm:$0xf0]  ;;  %v3160_v41 = vor.u32 %v3779_v33, %v3159_v32  ;;  %v3164_v42 = vor.u32 %v3777_v34, %v3161_v35 }
  0x19   :  { %459 = vmatpush.bf16.msra.mxu3 %v3813_v23  ;;  %v3822_v40 = vld [vmem:[%s4815_s1 + $0x118] sm:$0xff]  ;;  %v3168_v43 = vor.u32 %v3780_v37, %v3167_v36  ;;  %v3172_v44 = vor.u32 %v3778_v38, %v3169_v39  ;;  %v3821_v45 = vld [vmem:[%s4815_s1 + $0x110] sm:$0xff]  ;;  %v3820_v46 = vld [vmem:[%s4815_s1 + $0x108] sm:$0xff] }
  0x1a   :  { %403 = vmatpush.bf16.msra.mxu0 %v3788_v24  ;;  %v3819_v47 = vld [vmem:[%s4815_s1 + $0x100] sm:$0xff]  ;;  %v3179_v48 = vld [vmem:[%s4814_s0 + $0x28] sm:$0xf]  ;;  %v3784_v49 = vld [vmem:[%s4814_s0 + $0x38] sm:$0xf0] }
  0x1b   :  { %422 = vmatpush.bf16.msra.mxu1 %v3796_v25  ;;  %v3782_v50 = vld [vmem:[%s4814_s0 + $0x2c] sm:$0xf]  ;;  %v3181_v51 = vld [vmem:[%s4814_s0 + $0x3c] sm:$0xf0]  ;;  %v3187_v52 = vld [vmem:[%s4814_s0 + $0x30] sm:$0xf]  ;;  %v3180_v56 = vor.u32 %v3784_v49, %v3179_v48 }
  0x1c   :  { %441 = vmatpush.bf16.msra.mxu2 %v3804_v26  ;;  %v3785_v53 = vld [vmem:[%s4814_s0 + $0x40] sm:$0xf0]  ;;  %v3783_v54 = vld [vmem:[%s4814_s0 + $0x34] sm:$0xf]  ;;  %v3189_v55 = vld [vmem:[%s4814_s0 + $0x44] sm:$0xf0]  ;;  %v3184_v57 = vor.u32 %v3782_v50, %v3181_v51 }
  0x1d   :  { %460 = vmatpush.bf16.msra.mxu3 %v3812_v27  ;;  %v3188_v58 = vor.u32 %v3785_v53, %v3187_v52  ;;  %v3192_v59 = vor.u32 %v3783_v54, %v3189_v55  ;;  %v3175_v60 = vld [vmem:[%s4814_s0 + $0x10] sm:$0xf]  ;;  %v3781_v61 = vld [vmem:[%s4814_s0 + $0x20] sm:$0xf0]  ;;  %v3195_v63 = vld [vmem:[%s4814_s0 + $0x38] sm:$0xf] }
  0x1e   :  { %404 = vmatpush.bf16.msra.mxu0 %v3787_v28  ;;  %v3176_v62 = vor.u32 %v3781_v61, %v3175_v60  ;;  %v3786_v0 = vld [vmem:[%s4814_s0 + $0x48] sm:$0xf0]  ;;  %v4020_v25 = vmov 32.0  }
  0x1f   :  { %423 = vmatpush.bf16.msra.mxu1 %v3795_v29  ;;  %v3196_v1 = vor.u32 %v3786_v0, %v3195_v63  ;;  %3988 = vrcp.f32 %v4020_v25 }
  0x20   :  { %442 = vmatpush.bf16.msra.mxu2 %v3803_v30 }
  0x21   :  { %461 = vmatpush.bf16.msra.mxu3 %v3811_v31  ;;  %405 = vmatmul.bf16.vlgmr.msra.gmra.mxu0 %v3160_v41 }
  0x22   :  { %477 = vmatpush.bf16.msrb.mxu0 %v3822_v40  ;;  %424 = vmatmul.bf16.vlgmr.msra.gmra.mxu1 %v3164_v42 }
  0x23   :  { %443 = vmatmul.bf16.vlgmr.msra.gmra.mxu2 %v3168_v43 }
  0x24   :  { %462 = vmatmul.bf16.vlgmr.msra.gmra.mxu3 %v3172_v44 }
  0x25   :  { %v3989_v37 = vpop.eup %3988 }
  0x26   :  { %478 = vmatpush.bf16.msrb.mxu0 %v3821_v45  ;;  %v508_v45 = vmul.f32 32.0, %v3989_v37  ;;  %vm512_vm1 = vweird.f32 %v3989_v37 }
  0x28   :  { %v509_v54 = vsub.f32 1.0, %v508_v45 }
  0x2a   :  { %479 = vmatpush.bf16.msrb.mxu0 %v3820_v46  ;;  %v510_v61 = vmul.f32 %v3989_v37, %v509_v54 }
  0x2e   :  { %480 = vmatpush.bf16.msrb.mxu0 %v3819_v47 }
  0x31   :  { %410 = vmatmul.bf16.gmra.mxu0 %v3180_v56 }
  0x32   :  { %429 = vmatmul.bf16.gmra.mxu1 %v3184_v57 }
  0x33   :  { %448 = vmatmul.bf16.gmra.mxu2 %v3188_v58 }
  0x34   :  { %467 = vmatmul.bf16.gmra.mxu3 %v3192_v59 }
  0x41   :  { %3341 = vmatmul.msk.bf16.vlgmr.msrb.gmra.mxu0 %vm390_vm0, %v3176_v62 }
  0x51   :  { %3342 = vmatmul.msk.bf16.gmra.mxu0 %vm390_vm0, %v3196_v1 }
  0x9e   :  { %v406_v2 = vpop.f32.mrf.mxu0 }
  0x9f   :  { %v425_v4 = vpop.f32.mrf.mxu1 }
  0xa0   :  { %v426_v17 = vadd.f32 %v425_v4, %v406_v2  ;;  %v511_v2 = vadd.f32 %v3989_v37, %v510_v61 }
  0xa6   :  { %v408_v3 = vpop.f32.mrf.mxu0  ;;  %v444_v6 = vpop.f32.mrf.mxu2 }
  0xa7   :  { %v463_v7 = vpop.f32.mrf.mxu3  ;;  %v427_v9 = vpop.f32.mrf.mxu1  ;;  %v445_v21 = vadd.f32 %v444_v6, %v426_v17 }
  0xa8   :  { %v428_v15 = vadd.f32 %v427_v9, %v408_v3 }
  0xa9   :  { %v464_v26 = vadd.f32 %v463_v7, %v445_v21  ;;  %v4284_v7 = vsel %vm512_vm1, %v3989_v37, %v511_v2 }
  0xae   :  { %v411_v5 = vpop.f32.mrf.mxu0  ;;  %v446_v10 = vpop.f32.mrf.mxu2 }
  0xaf   :  { %v465_v11 = vpop.f32.mrf.mxu3  ;;  %v430_v13 = vpop.f32.mrf.mxu1  ;;  %v447_v18 = vadd.f32 %v446_v10, %v428_v15  ;;  %v4021_v15 = vmov 0.0  }
  0xb0   :  { %v431_v19 = vadd.f32 %v430_v13, %v411_v5  ;;  %564 = vst.msk [vmem:[#allocation2] sm:$0xf] %vm563_vm2, %v4021_v15 }
  0xb1   :  { %v466_v23 = vadd.f32 %v465_v11, %v447_v18  ;;  %565 = vst.msk [vmem:[#allocation2 + $0x4] sm:$0xf] %vm563_vm2, %v4021_v15 }
  0xb2   :  { %566 = vst.msk [vmem:[#allocation2 + $0x8] sm:$0xf] %vm563_vm2, %v4021_v15 }
  0xb3   :  { %567 = vst.msk [vmem:[#allocation2 + $0xc] sm:$0xf] %vm563_vm2, %v4021_v15 }
  0xb4   :  { %568 = vst.msk [vmem:[#allocation2 + $0x10] sm:$0xf] %vm563_vm2, %v4021_v15 }
  0xb5   :  { %569 = vst.msk [vmem:[#allocation2 + $0x14] sm:$0xf] %vm563_vm2, %v4021_v15 }
  0xb6   :  { %v413_v8 = vpop.f32.mrf.mxu0  ;;  %v449_v14 = vpop.f32.mrf.mxu2  ;;  %570 = vst.msk [vmem:[#allocation2 + $0x18] sm:$0xf] %vm563_vm2, %v4021_v15 }
  0xb7   :  { %v468_v20 = vpop.f32.mrf.mxu3  ;;  %v450_v22 = vadd.f32 %v449_v14, %v431_v19  ;;  %v432_v24 = vpop.f32.mrf.mxu1  ;;  %571 = vst.msk [vmem:[#allocation2 + $0x1c] sm:$0xf] %vm563_vm2, %v4021_v15 }
  0xb8   :  { %v433_v30 = vadd.f32 %v432_v24, %v413_v8  ;;  %572 = vst.msk [vmem:[#allocation2 + $0x20] sm:$0xf] %vm563_vm2, %v4021_v15 }
  0xb9   :  { %v469_v27 = vadd.f32 %v468_v20, %v450_v22  ;;  %573 = vst.msk [vmem:[#allocation2 + $0x24] sm:$0xf] %vm563_vm2, %v4021_v15  ;;  %v630_v22 = vld [vmem:[#allocation2] sm:$0x3] }
  0xba   :  { %574 = vst.msk [vmem:[#allocation2 + $0x28] sm:$0xf] %vm563_vm2, %v4021_v15 }
  0xbb   :  { %575 = vst.msk [vmem:[#allocation2 + $0x2c] sm:$0xf] %vm563_vm2, %v4021_v15 }
  0xbc   :  { %576 = vst.msk [vmem:[#allocation2 + $0x30] sm:$0xf] %vm563_vm2, %v4021_v15 }
  0xbd   :  { %577 = vst.msk [vmem:[#allocation2 + $0x34] sm:$0xf] %vm563_vm2, %v4021_v15 }
  0xbe   :  { %v482_v12 = vpop.f32.mrf.mxu0  ;;  %v451_v28 = vpop.f32.mrf.mxu2  ;;  %578 = vst.msk [vmem:[#allocation2 + $0x38] sm:$0xf] %vm563_vm2, %v4021_v15 }
  0xbf   :  { %v4258_v32 = vadd.f32 %v482_v12, %v464_v26  ;;  %v452_v34 = vadd.f32 %v451_v28, %v433_v30  ;;  %v470_v35 = vpop.f32.mrf.mxu3  ;;  %579 = vst.msk [vmem:[#allocation2 + $0x3c] sm:$0xf] %vm563_vm2, %v4021_v15 }
  0xc0   :  { %580 = vst.msk [vmem:[#allocation2 + $0x40] sm:$0xf] %vm563_vm2, %v4021_v15 }
  0xc1   :  { %v515_v38 = vmul.f32 %v4258_v32, %v4258_v32  ;;  %v471_v41 = vadd.f32 %v470_v35, %v452_v34  ;;  %v494_v42 = vsel %vm390_vm0, %v4258_v32, 0.0  ;;  %581 = vst.msk [vmem:[#allocation2 + $0x44] sm:$0xf] %vm563_vm2, %v4021_v15 }
  0xc2   :  { %582 = vst.msk [vmem:[#allocation2 + $0x48] sm:$0xf] %vm563_vm2, %v4021_v15 }
  0xc3   :  { %v519_v48 = vsel %vm390_vm0, %v515_v38, 0.0  ;;  %583 = vst.msk [vmem:[#allocation2 + $0x4c] sm:$0xf] %vm563_vm2, %v4021_v15 }
  0xc4   :  { %791 = vst [vmem:[#allocation1] ss:$4 sm:$0xff] %v630_v22 }
  0xc5   :  { %1717 = vst [vmem:[#allocation3] sm:$0xf] %v4021_v15 }
  0xc6   :  { %v484_v16 = vpop.f32.mrf.mxu0  ;;  %1727 = vst [vmem:[#allocation3 + $0x28] sm:$0xf] %v4021_v15 }
  0xc7   :  { %v4256_v29 = vadd.f32 %v484_v16, %v466_v23  ;;  %v492_v23 = vld [vmem:[%s4816_s2] sm:$0x1]  ;;  %1718 = vst [vmem:[#allocation3 + $0x4] sm:$0xf] %v4021_v15  ;;  %s4022_s2 = smov 64  }
  0xc8   :  { %1719 = vst [vmem:[#allocation3 + $0x8] sm:$0xf] %v4021_v15 }
  0xc9   :  { %v516_v36 = vmul.f32 %v4256_v29, %v4256_v29  ;;  %v495_v39 = vsel %vm390_vm0, %v4256_v29, 0.0  ;;  %1720 = vst [vmem:[#allocation3 + $0xc] sm:$0xf] %v4021_v15 }
  0xca   :  { %v496_v46 = vadd.f32 %v495_v39, %v494_v42  ;;  %1721 = vst [vmem:[#allocation3 + $0x10] sm:$0xf] %v4021_v15 }
  0xcb   :  { %v520_v43 = vsel %vm390_vm0, %v516_v36, 0.0  ;;  %1722 = vst [vmem:[#allocation3 + $0x14] sm:$0xf] %v4021_v15 }
  0xcc   :  { %v521_v51 = vadd.f32 %v520_v43, %v519_v48  ;;  %1723 = vst [vmem:[#allocation3 + $0x18] sm:$0xf] %v4021_v15 }
  0xcd   :  { %1724 = vst [vmem:[#allocation3 + $0x1c] sm:$0xf] %v4021_v15 }
  0xce   :  { %v487_v31 = vpop.f32.mrf.mxu0  ;;  %1725 = vst [vmem:[#allocation3 + $0x20] sm:$0xf] %v4021_v15 }
  0xcf   :  { %v4260_v33 = vadd.f32 %v487_v31, %v469_v27  ;;  %v493_v27 = vld [vmem:[%s4817_s3] sm:$0x1]  ;;  %1726 = vst [vmem:[#allocation3 + $0x24] sm:$0xf] %v4021_v15 }
  0xd0   :  { %1728 = vst [vmem:[#allocation3 + $0x2c] sm:$0xf] %v4021_v15 }
  0xd1   :  { %v517_v40 = vmul.f32 %v4260_v33, %v4260_v33  ;;  %v497_v44 = vsel %vm390_vm0, %v4260_v33, 0.0  ;;  %1729 = vst [vmem:[#allocation3 + $0x30] sm:$0xf] %v4021_v15 }
  0xd2   :  { %v498_v52 = vadd.f32 %v497_v44, %v496_v46  ;;  %1730 = vst [vmem:[#allocation3 + $0x34] sm:$0xf] %v4021_v15 }
  0xd3   :  { %v522_v49 = vsel %vm390_vm0, %v517_v40, 0.0  ;;  %1731 = vst [vmem:[#allocation3 + $0x38] sm:$0xf] %v4021_v15 }
  0xd4   :  { %v523_v56 = vadd.f32 %v522_v49, %v521_v51  ;;  %1732 = vst [vmem:[#allocation3 + $0x3c] sm:$0xf] %v4021_v15 }
  0xd5   :  { %1733 = vst [vmem:[#allocation3 + $0x40] sm:$0xf] %v4021_v15 }
  0xd6   :  { %v489_v47 = vpop.f32.mrf.mxu0  ;;  %1734 = vst [vmem:[#allocation3 + $0x44] sm:$0xf] %v4021_v15 }
  0xd7   :  { %v4277_v50 = vadd.f32 %v489_v47, %v471_v41  ;;  %1735 = vst [vmem:[#allocation3 + $0x48] sm:$0xf] %v4021_v15 }
  0xd8   :  { %1736 = vst [vmem:[#allocation3 + $0x4c] sm:$0xf] %v4021_v15 }
  0xd9   :  { %v499_v53 = vsel %vm390_vm0, %v4277_v50, 0.0  ;;  %v518_v55 = vmul.f32 %v4277_v50, %v4277_v50 }
  0xda   :  { %v500_v57 = vadd.f32 %v499_v53, %v498_v52 }
  0xdb   :  { %v524_v58 = vsel %vm390_vm0, %v518_v55, 0.0 }
  0xdc   :  { %v501_v59 = vrot.slane %v500_v57, 4  ;;  %v525_v60 = vadd.f32 %v524_v58, %v523_v56 }
  0xde   :  { %v502_v62 = vadd.f32 %v501_v59, %v500_v57  ;;  %v526_v63 = vrot.slane %v525_v60, 4  ;;  %v638_v59 = vld [vmem:[#allocation2 + $0x28] sm:$0x3] }
  0xe0   :  { %v503_v0 = vrot.slane %v502_v62, 2  ;;  %v527_v1 = vadd.f32 %v526_v63, %v525_v60 }
  0xe2   :  { %v504_v3 = vadd.f32 %v503_v0, %v502_v62  ;;  %v528_v4 = vrot.slane %v527_v1, 2 }
  0xe4   :  { %v505_v5 = vrot.slane %v504_v3, 1  ;;  %v529_v6 = vadd.f32 %v528_v4, %v527_v1 }
  0xe6   :  { %v506_v8 = vadd.f32 %v505_v5, %v504_v3  ;;  %v530_v9 = vrot.slane %v529_v6, 1  ;;  %v646_v5 = vld [vmem:[#allocation2 + $0x1] sm:$0x3] }
  0xe8   :  { %v514_v10 = vmul.f32 %v4284_v7, %v506_v8  ;;  %v531_v11 = vadd.f32 %v530_v9, %v529_v6 }
  0xea   :  { %v532_v12 = vmul.f32 %v531_v11, %v4284_v7  ;;  %v533_v13 = vmul.f32 %v514_v10, %v514_v10 }
  0xec   :  { %v534_v14 = vsub.f32 %v532_v12, %v533_v13 }
  0xee   :  { %v535_v16 = vadd.f32 1e-05, %v534_v14 }
  0xf0   :  { %3990 = vrsqrt.f32 %v535_v16  ;;  %vm542_vm4 = vweird.f32 %v535_v16 }
  0xf6   :  { %v3991_v17 = vpop.eup %3990 }
  0xf7   :  { %v537_v18 = vmul.f32 %v3991_v17, %v535_v16  ;;  %vm543_vm3 = vweird.f32 %v3991_v17 }
  0xf8   :  { %vm544_vm5 = vmor %vm542_vm4, %vm543_vm3 }
  0xf9   :  { %v538_v19 = vmul.f32 %v3991_v17, %v537_v18 }
  0xfb   :  { %v539_v20 = vmul.f32 0.5, %v538_v19 }
  0xfd   :  { %v540_v21 = vsub.f32 1.5, %v539_v20 }
  0xff   :  { %v541_v24 = vmul.f32 %v3991_v17, %v540_v21 }
 0x101   :  { %v545_v25 = vsel %vm544_vm5, %v3991_v17, %v541_v24  ;;  %v654_v17 = vld [vmem:[#allocation2 + $0x29] sm:$0x3] }
 0x102   :  { %v546_v26 = vmul.f32 %v545_v25, %v492_v23 }
 0x104   :  { %v554_v28 = vmul.f32 %v546_v26, %v514_v10  ;;  %v548_v30 = vperm.slane %v546_v26, 0 }
 0x106   :  { %v555_v31 = vsub.f32 %v493_v27, %v554_v28  ;;  %v550_v34 = vmul.f32 %v548_v30, %v4258_v32  ;;  %v551_v35 = vmul.f32 %v548_v30, %v4256_v29  ;;  %v552_v39 = vmul.f32 %v548_v30, %v4260_v33  ;;  %v662_v27 = vld [vmem:[#allocation2 + $0x2] sm:$0x3] }
 0x107   :  { %v553_v44 = vmul.f32 %v548_v30, %v4277_v50 }
 0x108   :  { %v557_v36 = vperm.slane %v555_v31, 0 }
 0x10a   :  { %v559_v37 = vadd.f32 %v557_v36, %v550_v34  ;;  %v560_v38 = vadd.f32 %v557_v36, %v551_v35  ;;  %v561_v29 = vadd.f32 %v557_v36, %v552_v39  ;;  %v562_v33 = vadd.f32 %v557_v36, %v553_v44 }
 0x10c   :  { %v588_v40 = vrot.slane %v559_v37, 2  ;;  %v589_v41 = vrot.slane %v559_v37, 4  ;;  %v590_v42 = vrot.slane %v559_v37, 6  ;;  %614 = vst.msk [vmem:[#allocation2 + $0x5] sm:$0x3] %vm613_vm6, %v559_v37  ;;  %v591_v32 = vrot.slane %v560_v38, 2 }
 0x10d   :  { %618 = vst.msk [vmem:[#allocation2 + $0x15] sm:$0x3] %vm613_vm6, %v560_v38  ;;  %v592_v43 = vrot.slane %v560_v38, 4  ;;  %v593_v45 = vrot.slane %v560_v38, 6  ;;  %v594_v46 = vrot.slane %v561_v29, 2  ;;  %v595_v47 = vrot.slane %v561_v29, 4 }
 0x10e   :  { %615 = vst.msk [vmem:[#allocation2 + $0x9] sm:$0x3] %vm613_vm6, %v588_v40  ;;  %v596_v48 = vrot.slane %v561_v29, 6  ;;  %v597_v49 = vrot.slane %v562_v33, 2  ;;  %v598_v50 = vrot.slane %v562_v33, 4  ;;  %v599_v51 = vrot.slane %v562_v33, 6 }
 0x10f   :  { %616 = vst.msk [vmem:[#allocation2 + $0xd] sm:$0x3] %vm613_vm6, %v589_v41  ;;  %v670_v40 = vld [vmem:[#allocation2 + $0x2a] sm:$0x3] }
 0x110   :  { %617 = vst.msk [vmem:[#allocation2 + $0x11] sm:$0x3] %vm613_vm6, %v590_v42 }
 0x111   :  { %619 = vst.msk [vmem:[#allocation2 + $0x19] sm:$0x3] %vm613_vm6, %v591_v32 }
 0x112   :  { %620 = vst.msk [vmem:[#allocation2 + $0x1d] sm:$0x3] %vm613_vm6, %v592_v43 }
 0x113   :  { %621 = vst.msk [vmem:[#allocation2 + $0x21] sm:$0x3] %vm613_vm6, %v593_v45  ;;  %v631_v52 = vld [vmem:[#allocation2 + $0x4] sm:$0x3]  ;;  %v663_v30 = vld [vmem:[#allocation2 + $0x6] sm:$0x3] }
 0x114   :  { %622 = vst.msk [vmem:[#allocation2 + $0x2d] sm:$0x3] %vm613_vm6, %v561_v29  ;;  %v635_v56 = vld [vmem:[#allocation2 + $0x14] sm:$0x3]  ;;  %v647_v8 = vld [vmem:[#allocation2 + $0x5] sm:$0x3] }
 0x115   :  { %623 = vst.msk [vmem:[#allocation2 + $0x31] sm:$0x3] %vm613_vm6, %v594_v46  ;;  %v632_v53 = vld [vmem:[#allocation2 + $0x8] sm:$0x3]  ;;  %v651_v13 = vld [vmem:[#allocation2 + $0x15] sm:$0x3] }
 0x116   :  { %624 = vst.msk [vmem:[#allocation2 + $0x35] sm:$0x3] %vm613_vm6, %v595_v47  ;;  %v633_v54 = vld [vmem:[#allocation2 + $0xc] sm:$0x3]  ;;  %v648_v9 = vld [vmem:[#allocation2 + $0x9] sm:$0x3] }
 0x117   :  { %625 = vst.msk [vmem:[#allocation2 + $0x39] sm:$0x3] %vm613_vm6, %v596_v48  ;;  %v634_v55 = vld [vmem:[#allocation2 + $0x10] sm:$0x3]  ;;  %v649_v10 = vld [vmem:[#allocation2 + $0xd] sm:$0x3] }
 0x118   :  { %626 = vst.msk [vmem:[#allocation2 + $0x3d] sm:$0x3] %vm613_vm6, %v562_v33  ;;  %v636_v57 = vld [vmem:[#allocation2 + $0x18] sm:$0x3]  ;;  %v650_v11 = vld [vmem:[#allocation2 + $0x11] sm:$0x3] }
 0x119   :  { %627 = vst.msk [vmem:[#allocation2 + $0x41] sm:$0x3] %vm613_vm6, %v597_v49  ;;  %v637_v58 = vld [vmem:[#allocation2 + $0x1c] sm:$0x3]  ;;  %v652_v14 = vld [vmem:[#allocation2 + $0x19] sm:$0x3] }
 0x11a   :  { %628 = vst.msk [vmem:[#allocation2 + $0x45] sm:$0x3] %vm613_vm6, %v598_v50  ;;  %v653_v16 = vld [vmem:[#allocation2 + $0x1d] sm:$0x3]  ;;  %v664_v15 = vld [vmem:[#allocation2 + $0xa] sm:$0x3] }
 0x11b   :  { %629 = vst.msk [vmem:[#allocation2 + $0x49] sm:$0x3] %vm613_vm6, %v599_v51  ;;  %v639_v61 = vld [vmem:[#allocation2 + $0x2c] sm:$0x3]  ;;  %v665_v31 = vld [vmem:[#allocation2 + $0xe] sm:$0x3] }
 0x11c   :  { %793 = vst [vmem:[#allocation1 + $0x1] ss:$4 sm:$0xff] %v631_v52  ;;  %v640_v62 = vld [vmem:[#allocation2 + $0x30] sm:$0x3]  ;;  %v655_v19 = vld [vmem:[#allocation2 + $0x2d] sm:$0x3] }
 0x11d   :  { %795 = vst [vmem:[#allocation1 + $0x2] ss:$4 sm:$0xff] %v632_v53  ;;  %v641_v63 = vld [vmem:[#allocation2 + $0x34] sm:$0x3]  ;;  %v656_v20 = vld [vmem:[#allocation2 + $0x31] sm:$0x3] }
 0x11e   :  { %797 = vst [vmem:[#allocation1 + $0x3] ss:$4 sm:$0xff] %v633_v54  ;;  %v642_v0 = vld [vmem:[#allocation2 + $0x38] sm:$0x3]  ;;  %v657_v21 = vld [vmem:[#allocation2 + $0x35] sm:$0x3] }
 0x11f   :  { %799 = vst [vmem:[#allocation1 + $0x20] ss:$4 sm:$0xff] %v634_v55  ;;  %v643_v2 = vld [vmem:[#allocation2 + $0x3c] sm:$0x3]  ;;  %v658_v22 = vld [vmem:[#allocation2 + $0x39] sm:$0x3] }
 0x120   :  { %801 = vst [vmem:[#allocation1 + $0x21] ss:$4 sm:$0xff] %v635_v56  ;;  %v644_v3 = vld [vmem:[#allocation2 + $0x40] sm:$0x3]  ;;  %v659_v24 = vld [vmem:[#allocation2 + $0x3d] sm:$0x3] }
 0x121   :  { %803 = vst [vmem:[#allocation1 + $0x22] ss:$4 sm:$0xff] %v636_v57  ;;  %v645_v4 = vld [vmem:[#allocation2 + $0x44] sm:$0x3]  ;;  %v660_v25 = vld [vmem:[#allocation2 + $0x41] sm:$0x3] }
 0x122   :  { %805 = vst [vmem:[#allocation1 + $0x23] ss:$4 sm:$0xff] %v637_v58  ;;  %v661_v26 = vld [vmem:[#allocation2 + $0x45] sm:$0x3]  ;;  %v666_v34 = vld [vmem:[#allocation2 + $0x12] sm:$0x3] }
 0x123   :  { %v667_v36 = vld [vmem:[#allocation2 + $0x16] sm:$0x3]  ;;  %v668_v37 = vld [vmem:[#allocation2 + $0x1a] sm:$0x3]  ;;  %v669_v38 = vld [vmem:[#allocation2 + $0x1e] sm:$0x3] }
 0x124   :  { %v671_v42 = vld [vmem:[#allocation2 + $0x2e] sm:$0x3]  ;;  %v672_v29 = vld [vmem:[#allocation2 + $0x32] sm:$0x3]  ;;  %v673_v32 = vld [vmem:[#allocation2 + $0x36] sm:$0x3] }
 0x125   :  { %v4367_v60 = vld.sshfl [vmem:[#allocation1] sm:$0xff pattern:$0x73625140]  ;;  %v676_v46 = vld [vmem:[#allocation2 + $0x42] sm:$0x3] }
 0x126   :  { %808 = vst [vmem:[#allocation1] ss:$4 sm:$0xff] %v638_v59  ;;  %v674_v43 = vld [vmem:[#allocation2 + $0x3a] sm:$0x3]  ;;  %v675_v33 = vld [vmem:[#allocation2 + $0x3e] sm:$0x3] }
 0x127   :  { %809 = vst [vmem:[#allocation1 + $0x1] ss:$4 sm:$0xff] %v639_v61  ;;  %v677_v47 = vld [vmem:[#allocation2 + $0x46] sm:$0x3]  ;;  %v678_v48 = vld [vmem:[#allocation2 + $0x4] sm:$0x3] }
 0x128   :  { %810 = vst [vmem:[#allocation1 + $0x2] ss:$4 sm:$0xff] %v640_v62  ;;  %v679_v50 = vld [vmem:[#allocation2 + $0x8] sm:$0x3]  ;;  %v680_v51 = vld [vmem:[#allocation2 + $0xc] sm:$0x3] }
 0x129   :  { %v4370_v1 = vld.sshfl [vmem:[#allocation1 + $0x20] sm:$0xff pattern:$0x73625140]  ;;  %811 = vst [vmem:[#allocation1 + $0x3] ss:$4 sm:$0xff] %v641_v63 }
 0x12a   :  { %812 = vst [vmem:[#allocation1 + $0x20] ss:$4 sm:$0xff] %v642_v0  ;;  %v681_v52 = vld [vmem:[#allocation2 + $0x10] sm:$0x3]  ;;  %v682_v53 = vld [vmem:[#allocation2 + $0x14] sm:$0x3] }
 0x12b   :  { %813 = vst [vmem:[#allocation1 + $0x21] ss:$4 sm:$0xff] %v643_v2  ;;  %v683_v55 = vld [vmem:[#allocation2 + $0x18] sm:$0x3]  ;;  %v684_v56 = vld [vmem:[#allocation2 + $0x1c] sm:$0x3] }
 0x12c   :  { %814 = vst [vmem:[#allocation1 + $0x22] ss:$4 sm:$0xff] %v644_v3  ;;  %v685_v57 = vld [vmem:[#allocation2 + $0x20] sm:$0x3]  ;;  %v686_v58 = vld [vmem:[#allocation2 + $0x2c] sm:$0x3] }
 0x12d   :  { %815 = vst [vmem:[#allocation1 + $0x23] ss:$4 sm:$0xff] %v645_v4  ;;  %v687_v61 = vld [vmem:[#allocation2 + $0x30] sm:$0x3]  ;;  %v688_v62 = vld [vmem:[#allocation2 + $0x34] sm:$0x3] }
 0x12e   :  { %v689_v63 = vld [vmem:[#allocation2 + $0x38] sm:$0x3]  ;;  %v690_v0 = vld [vmem:[#allocation2 + $0x3c] sm:$0x3]  ;;  %v691_v3 = vld [vmem:[#allocation2 + $0x40] sm:$0x3] }
 0x12f   :  { %v692_v4 = vld [vmem:[#allocation2 + $0x44] sm:$0x3] }
 0x130   :  { %v4374_v6 = vld.sshfl [vmem:[#allocation1] sm:$0xff pattern:$0x73625140] }
 0x131   :  { %838 = vst [vmem:[#allocation1] ss:$4 sm:$0xff] %v646_v5 }
 0x132   :  { %840 = vst [vmem:[#allocation1 + $0x1] ss:$4 sm:$0xff] %v647_v8  ;;  %v693_v8 = vld [vmem:[#allocation2 + $0x48] sm:$0x3] }
 0x133   :  { %842 = vst [vmem:[#allocation1 + $0x2] ss:$4 sm:$0xff] %v648_v9  ;;  %v694_v9 = vld [vmem:[#allocation2 + $0x5] sm:$0x3] }
 0x134   :  { %v4377_v12 = vld.sshfl [vmem:[#allocation1 + $0x20] sm:$0xff pattern:$0x73625140]  ;;  %844 = vst [vmem:[#allocation1 + $0x3] ss:$4 sm:$0xff] %v649_v10 }
 0x135   :  { %846 = vst [vmem:[#allocation1 + $0x20] ss:$4 sm:$0xff] %v650_v11  ;;  %v695_v11 = vld [vmem:[#allocation2 + $0x9] sm:$0x3] }
 0x136   :  { %848 = vst [vmem:[#allocation1 + $0x21] ss:$4 sm:$0xff] %v651_v13  ;;  %v696_v13 = vld [vmem:[#allocation2 + $0xd] sm:$0x3] }
 0x137   :  { %850 = vst [vmem:[#allocation1 + $0x22] ss:$4 sm:$0xff] %v652_v14  ;;  %v697_v14 = vld [vmem:[#allocation2 + $0x11] sm:$0x3] }
 0x138   :  { %852 = vst [vmem:[#allocation1 + $0x23] ss:$4 sm:$0xff] %v653_v16  ;;  %v698_v16 = vld [vmem:[#allocation2 + $0x15] sm:$0x3] }
 0x13b   :  { %v853_v18 = vld.sshfl [vmem:[#allocation1] sm:$0xff pattern:$0x73625140] }
 0x13c   :  { %855 = vst [vmem:[#allocation1] ss:$4 sm:$0xff] %v654_v17 }
 0x13d   :  { %856 = vst [vmem:[#allocation1 + $0x1] ss:$4 sm:$0xff] %v655_v19  ;;  %v700_v19 = vld [vmem:[#allocation2 + $0x1d] sm:$0x3] }
 0x13e   :  { %857 = vst [vmem:[#allocation1 + $0x2] ss:$4 sm:$0xff] %v656_v20  ;;  %v701_v20 = vld [vmem:[#allocation2 + $0x21] sm:$0x3] }
 0x13f   :  { %v854_v23 = vld.sshfl [vmem:[#allocation1 + $0x20] sm:$0xff pattern:$0x73625140]  ;;  %858 = vst [vmem:[#allocation1 + $0x3] ss:$4 sm:$0xff] %v657_v21 }
 0x140   :  { %859 = vst [vmem:[#allocation1 + $0x20] ss:$4 sm:$0xff] %v658_v22  ;;  %v3945_v39 = vpack.i.bf16 %v854_v23, %v853_v18  ;;  %v699_v18 = vld [vmem:[#allocation2 + $0x19] sm:$0x3]  ;;  %v702_v21 = vld [vmem:[#allocation2 + $0x2d] sm:$0x3] }
 0x141   :  { %860 = vst [vmem:[#allocation1 + $0x21] ss:$4 sm:$0xff] %v659_v24  ;;  %v703_v23 = vld [vmem:[#allocation2 + $0x31] sm:$0x3]  ;;  %v704_v24 = vld [vmem:[#allocation2 + $0x35] sm:$0x3] }
 0x142   :  { %861 = vst [vmem:[#allocation1 + $0x22] ss:$4 sm:$0xff] %v660_v25  ;;  %3946 = vrot.lane.b32.xlu0 %v3945_v39, %s4022_s2  ;;  %v705_v25 = vld [vmem:[#allocation2 + $0x39] sm:$0x3] }
 0x143   :  { %862 = vst [vmem:[#allocation1 + $0x23] ss:$4 sm:$0xff] %v661_v26  ;;  %v706_v26 = vld [vmem:[#allocation2 + $0x3d] sm:$0x3] }
 0x146   :  { %v863_v28 = vld.sshfl [vmem:[#allocation1] sm:$0xff pattern:$0x73625140] }
 0x147   :  { %893 = vst [vmem:[#allocation1] ss:$4 sm:$0xff] %v662_v27 }
 0x148   :  { %895 = vst [vmem:[#allocation1 + $0x1] ss:$4 sm:$0xff] %v663_v30  ;;  %v708_v30 = vld [vmem:[#allocation2 + $0x45] sm:$0x3] }
 0x149   :  { %897 = vst [vmem:[#allocation1 + $0x2] ss:$4 sm:$0xff] %v664_v15  ;;  %v709_v15 = vld [vmem:[#allocation2 + $0x49] sm:$0x3] }
 0x14a   :  { %v864_v35 = vld.sshfl [vmem:[#allocation1 + $0x20] sm:$0xff pattern:$0x73625140]  ;;  %899 = vst [vmem:[#allocation1 + $0x3] ss:$4 sm:$0xff] %v665_v31 }
 0x14b   :  { %901 = vst [vmem:[#allocation1 + $0x20] ss:$4 sm:$0xff] %v666_v34  ;;  %v3950_v45 = vpack.i.bf16 %v864_v35, %v863_v28  ;;  %v707_v28 = vld [vmem:[#allocation2 + $0x41] sm:$0x3]  ;;  %v710_v31 = vld [vmem:[#allocation2 + $0x6] sm:$0x3] }
 0x14c   :  { %903 = vst [vmem:[#allocation1 + $0x21] ss:$4 sm:$0xff] %v667_v36  ;;  %v711_v35 = vld [vmem:[#allocation2 + $0xa] sm:$0x3]  ;;  %v712_v36 = vld [vmem:[#allocation2 + $0xe] sm:$0x3] }
 0x14d   :  { %905 = vst [vmem:[#allocation1 + $0x22] ss:$4 sm:$0xff] %v668_v37  ;;  %3951 = vrot.lane.b32.xlu0 %v3950_v45, %s4022_s2  ;;  %v713_v37 = vld [vmem:[#allocation2 + $0x12] sm:$0x3] }
 0x14e   :  { %907 = vst [vmem:[#allocation1 + $0x23] ss:$4 sm:$0xff] %v669_v38  ;;  %v714_v38 = vld [vmem:[#allocation2 + $0x16] sm:$0x3]  ;;  %v719_v45 = vld [vmem:[#allocation2 + $0x32] sm:$0x3] }
 0x151   :  { %v4383_v41 = vld.sshfl [vmem:[#allocation1] sm:$0xff pattern:$0x73625140] }
 0x152   :  { %910 = vst [vmem:[#allocation1] ss:$4 sm:$0xff] %v670_v40  ;;  %v715_v40 = vld [vmem:[#allocation2 + $0x1a] sm:$0x3] }
 0x153   :  { %911 = vst [vmem:[#allocation1 + $0x1] ss:$4 sm:$0xff] %v671_v42  ;;  %v716_v42 = vld [vmem:[#allocation2 + $0x1e] sm:$0x3] }
 0x154   :  { %912 = vst [vmem:[#allocation1 + $0x2] ss:$4 sm:$0xff] %v672_v29  ;;  %v717_v29 = vld [vmem:[#allocation2 + $0x22] sm:$0x3] }
 0x155   :  { %v4385_v44 = vld.sshfl [vmem:[#allocation1 + $0x20] sm:$0xff pattern:$0x73625140]  ;;  %913 = vst [vmem:[#allocation1 + $0x3] ss:$4 sm:$0xff] %v673_v32 }
 0x156   :  { %914 = vst [vmem:[#allocation1 + $0x20] ss:$4 sm:$0xff] %v674_v43  ;;  %v718_v32 = vld [vmem:[#allocation2 + $0x2e] sm:$0x3] }
 0x157   :  { %915 = vst [vmem:[#allocation1 + $0x21] ss:$4 sm:$0xff] %v675_v33  ;;  %v720_v33 = vld [vmem:[#allocation2 + $0x36] sm:$0x3] }
 0x158   :  { %916 = vst [vmem:[#allocation1 + $0x22] ss:$4 sm:$0xff] %v676_v46  ;;  %v721_v46 = vld [vmem:[#allocation2 + $0x3a] sm:$0x3] }
 0x159   :  { %917 = vst [vmem:[#allocation1 + $0x23] ss:$4 sm:$0xff] %v677_v47  ;;  %v722_v47 = vld [vmem:[#allocation2 + $0x3e] sm:$0x3] }
 0x15c   :  { %v4388_v49 = vld.sshfl [vmem:[#allocation1] sm:$0xff pattern:$0x73625140] }
 0x15d   :  { %940 = vst [vmem:[#allocation1] ss:$4 sm:$0xff] %v678_v48 }
 0x15e   :  { %942 = vst [vmem:[#allocation1 + $0x1] ss:$4 sm:$0xff] %v679_v50  ;;  %v723_v50 = vld [vmem:[#allocation2 + $0x42] sm:$0x3] }
 0x15f   :  { %944 = vst [vmem:[#allocation1 + $0x2] ss:$4 sm:$0xff] %v680_v51 }
 0x160   :  { %v4390_v54 = vld.sshfl [vmem:[#allocation1 + $0x20] sm:$0xff pattern:$0x73625140]  ;;  %946 = vst [vmem:[#allocation1 + $0x3] ss:$4 sm:$0xff] %v681_v52 }
 0x161   :  { %948 = vst [vmem:[#allocation1 + $0x20] ss:$4 sm:$0xff] %v682_v53  ;;  %v724_v52 = vld [vmem:[#allocation2 + $0x46] sm:$0x3]  ;;  %v725_v53 = vld [vmem:[#allocation2 + $0x4a] sm:$0x3] }
 0x162   :  { %950 = vst [vmem:[#allocation1 + $0x21] ss:$4 sm:$0xff] %v683_v55  ;;  %v727_v55 = vld [vmem:[#allocation2 + $0x8] sm:$0x3] }
 0x163   :  { %952 = vst [vmem:[#allocation1 + $0x22] ss:$4 sm:$0xff] %v684_v56 }
 0x164   :  { %954 = vst [vmem:[#allocation1 + $0x23] ss:$4 sm:$0xff] %v685_v57  ;;  %v728_v57 = vld [vmem:[#allocation2 + $0xc] sm:$0x3] }
 0x167   :  { %v955_v59 = vld.sshfl [vmem:[#allocation1] sm:$0xff pattern:$0x73625140] }
 0x168   :  { %957 = vst [vmem:[#allocation1] ss:$4 sm:$0xff] %v686_v58  ;;  %v729_v58 = vld [vmem:[#allocation2 + $0x10] sm:$0x3] }
 0x169   :  { %958 = vst [vmem:[#allocation1 + $0x1] ss:$4 sm:$0xff] %v687_v61  ;;  %v731_v61 = vld [vmem:[#allocation2 + $0x18] sm:$0x3] }
 0x16a   :  { %959 = vst [vmem:[#allocation1 + $0x2] ss:$4 sm:$0xff] %v688_v62 }
 0x16b   :  { %v956_v2 = vld.sshfl [vmem:[#allocation1 + $0x20] sm:$0xff pattern:$0x73625140]  ;;  %960 = vst [vmem:[#allocation1 + $0x3] ss:$4 sm:$0xff] %v689_v63 }
 0x16c   :  { %961 = vst [vmem:[#allocation1 + $0x20] ss:$4 sm:$0xff] %v690_v0  ;;  %v3955_v5 = vpack.i.bf16 %v956_v2, %v955_v59  ;;  %v730_v59 = vld [vmem:[#allocation2 + $0x14] sm:$0x3]  ;;  %v732_v63 = vld [vmem:[#allocation2 + $0x1c] sm:$0x3] }
 0x16d   :  { %962 = vst [vmem:[#allocation1 + $0x21] ss:$4 sm:$0xff] %v691_v3  ;;  %v734_v0 = vld [vmem:[#allocation2 + $0x24] sm:$0x3]  ;;  %v733_v3 = vld [vmem:[#allocation2 + $0x20] sm:$0x3] }
 0x16e   :  { %963 = vst [vmem:[#allocation1 + $0x22] ss:$4 sm:$0xff] %v692_v4  ;;  %3956 = vrot.lane.b32.xlu1 %v3955_v5, %s4022_s2  ;;  %v3830_v4 = vld [vmem:[%s4818_s4 + $0x38] sm:$0xff] }
 0x16f   :  { %964 = vst [vmem:[#allocation1 + $0x23] ss:$4 sm:$0xff] %v693_v8  ;;  %1550 = vmatpush.bf16.msrb.mxu1 %v3830_v4  ;;  %v735_v5 = vld [vmem:[#allocation2 + $0x30] sm:$0x3] }
 0x172   :  { %v4393_v10 = vld.sshfl [vmem:[#allocation1] sm:$0xff pattern:$0x73625140] }
 0x173   :  { %995 = vst [vmem:[#allocation1] ss:$4 sm:$0xff] %v694_v9  ;;  %v736_v9 = vld [vmem:[#allocation2 + $0x34] sm:$0x3] }
 0x174   :  { %997 = vst [vmem:[#allocation1 + $0x1] ss:$4 sm:$0xff] %v695_v11  ;;  %v3829_v11 = vld [vmem:[%s4818_s4 + $0x30] sm:$0xff] }
 0x175   :  { %999 = vst [vmem:[#allocation1 + $0x2] ss:$4 sm:$0xff] %v696_v13  ;;  %v737_v13 = vld [vmem:[#allocation2 + $0x38] sm:$0x3]  ;;  %1551 = vmatpush.bf16.msrb.mxu1 %v3829_v11 }
 0x176   :  { %v4395_v17 = vld.sshfl [vmem:[#allocation1 + $0x20] sm:$0xff pattern:$0x73625140]  ;;  %1001 = vst [vmem:[#allocation1 + $0x3] ss:$4 sm:$0xff] %v697_v14 }
 0x177   :  { %1003 = vst [vmem:[#allocation1 + $0x20] ss:$4 sm:$0xff] %v698_v16  ;;  %v738_v14 = vld [vmem:[#allocation2 + $0x3c] sm:$0x3]  ;;  %v739_v16 = vld [vmem:[#allocation2 + $0x40] sm:$0x3] }
 0x178   :  { %1005 = vst [vmem:[#allocation1 + $0x21] ss:$4 sm:$0xff] %v699_v18  ;;  %v740_v18 = vld [vmem:[#allocation2 + $0x44] sm:$0x3] }
 0x179   :  { %1007 = vst [vmem:[#allocation1 + $0x22] ss:$4 sm:$0xff] %v700_v19 }
 0x17a   :  { %1009 = vst [vmem:[#allocation1 + $0x23] ss:$4 sm:$0xff] %v701_v20  ;;  %v742_v20 = vld [vmem:[#allocation2 + $0x4c] sm:$0x3] }
 0x17d   :  { %v4397_v22 = vld.sshfl [vmem:[#allocation1] sm:$0xff pattern:$0x73625140] }
 0x17e   :  { %1012 = vst [vmem:[#allocation1] ss:$4 sm:$0xff] %v702_v21  ;;  %v3828_v21 = vld [vmem:[%s4818_s4 + $0x28] sm:$0xff] }
 0x17f   :  { %1013 = vst [vmem:[#allocation1 + $0x1] ss:$4 sm:$0xff] %v703_v23  ;;  %v741_v23 = vld [vmem:[#allocation2 + $0x48] sm:$0x3]  ;;  %1552 = vmatpush.bf16.msrb.mxu1 %v3828_v21  ;;  %v3836_v21 = vld [vmem:[%s4818_s4 + $0x68] sm:$0xff] }
 0x180   :  { %1014 = vst [vmem:[#allocation1 + $0x2] ss:$4 sm:$0xff] %v704_v24  ;;  %v3827_v24 = vld [vmem:[%s4818_s4 + $0x20] sm:$0xff] }
 0x181   :  { %v4399_v27 = vld.sshfl [vmem:[#allocation1 + $0x20] sm:$0xff pattern:$0x73625140]  ;;  %1015 = vst [vmem:[#allocation1 + $0x3] ss:$4 sm:$0xff] %v705_v25 }
 0x182   :  { %1016 = vst [vmem:[#allocation1 + $0x20] ss:$4 sm:$0xff] %v706_v26  ;;  %v743_v25 = vld [vmem:[#allocation2 + $0x9] sm:$0x3] }
 0x183   :  { %1017 = vst [vmem:[#allocation1 + $0x21] ss:$4 sm:$0xff] %v707_v28  ;;  %1553 = vmatpush.bf16.msrb.mxu1 %v3827_v24  ;;  %v744_v28 = vld [vmem:[#allocation2 + $0xd] sm:$0x3] }
 0x184   :  { %1018 = vst [vmem:[#allocation1 + $0x22] ss:$4 sm:$0xff] %v708_v30  ;;  %v745_v30 = vld [vmem:[#allocation2 + $0x11] sm:$0x3] }
 0x185   :  { %1019 = vst [vmem:[#allocation1 + $0x23] ss:$4 sm:$0xff] %v709_v15  ;;  %v3826_v15 = vld [vmem:[%s4818_s4 + $0x18] sm:$0xff] }
 0x187   :  { %1554 = vmatpush.bf16.msrb.mxu1 %v3826_v15  ;;  %v3853_v15 = vld [vmem:[%s4818_s4 + $0xf0] sm:$0xff] }
 0x188   :  { %v4401_v34 = vld.sshfl [vmem:[#allocation1] sm:$0xff pattern:$0x73625140] }
 0x189   :  { %1042 = vst [vmem:[#allocation1] ss:$4 sm:$0xff] %v710_v31  ;;  %v746_v31 = vld [vmem:[#allocation2 + $0x15] sm:$0x3] }
 0x18a   :  { %1044 = vst [vmem:[#allocation1 + $0x1] ss:$4 sm:$0xff] %v711_v35  ;;  %v747_v35 = vld [vmem:[#allocation2 + $0x19] sm:$0x3] }
 0x18b   :  { %1046 = vst [vmem:[#allocation1 + $0x2] ss:$4 sm:$0xff] %v712_v36 }
 0x18c   :  { %v4403_v39 = vld.sshfl [vmem:[#allocation1 + $0x20] sm:$0xff pattern:$0x73625140]  ;;  %1048 = vst [vmem:[#allocation1 + $0x3] ss:$4 sm:$0xff] %v713_v37 }
 0x18d   :  { %1050 = vst [vmem:[#allocation1 + $0x20] ss:$4 sm:$0xff] %v714_v38  ;;  %v748_v37 = vld [vmem:[#allocation2 + $0x1d] sm:$0x3]  ;;  %v750_v38 = vld [vmem:[#allocation2 + $0x25] sm:$0x3] }
 0x18e   :  { %1052 = vst [vmem:[#allocation1 + $0x21] ss:$4 sm:$0xff] %v715_v40  ;;  %v749_v40 = vld [vmem:[#allocation2 + $0x21] sm:$0x3] }
 0x18f   :  { %1054 = vst [vmem:[#allocation1 + $0x22] ss:$4 sm:$0xff] %v716_v42  ;;  %v3825_v42 = vld [vmem:[%s4818_s4 + $0x10] sm:$0xff] }
 0x190   :  { %1056 = vst [vmem:[#allocation1 + $0x23] ss:$4 sm:$0xff] %v717_v29  ;;  %1555 = vmatpush.bf16.msrb.mxu1 %v3825_v42  ;;  %v3824_v29 = vld [vmem:[%s4818_s4 + $0x8] sm:$0xff] }
 0x191   :  { %v3844_v42 = vld [vmem:[%s4818_s4 + $0xa8] sm:$0xff] }
 0x193   :  { %v1057_v43 = vld.sshfl [vmem:[#allocation1] sm:$0xff pattern:$0x73625140] }
 0x194   :  { %1059 = vst [vmem:[#allocation1] ss:$4 sm:$0xff] %v718_v32  ;;  %v751_v32 = vld [vmem:[#allocation2 + $0x31] sm:$0x3]  ;;  %1556 = vmatpush.bf16.msrb.mxu1 %v3824_v29 }
 0x195   :  { %1060 = vst [vmem:[#allocation1 + $0x1] ss:$4 sm:$0xff] %v719_v45  ;;  %v752_v45 = vld [vmem:[#allocation2 + $0x35] sm:$0x3]  ;;  %v767_v29 = vld [vmem:[#allocation2 + $0x32] sm:$0x3] }
 0x196   :  { %1061 = vst [vmem:[#allocation1 + $0x2] ss:$4 sm:$0xff] %v720_v33  ;;  %v753_v33 = vld [vmem:[#allocation2 + $0x39] sm:$0x3] }
 0x197   :  { %v1058_v48 = vld.sshfl [vmem:[#allocation1 + $0x20] sm:$0xff pattern:$0x73625140]  ;;  %1062 = vst [vmem:[#allocation1 + $0x3] ss:$4 sm:$0xff] %v721_v46 }
 0x198   :  { %1063 = vst [vmem:[#allocation1 + $0x20] ss:$4 sm:$0xff] %v722_v47  ;;  %v3960_v51 = vpack.i.bf16 %v1058_v48, %v1057_v43  ;;  %v754_v46 = vld [vmem:[#allocation2 + $0x3d] sm:$0x3]  ;;  %v755_v48 = vld [vmem:[#allocation2 + $0x41] sm:$0x3] }
 0x199   :  { %1064 = vst [vmem:[#allocation1 + $0x21] ss:$4 sm:$0xff] %v723_v50 }
 0x19a   :  { %1065 = vst [vmem:[#allocation1 + $0x22] ss:$4 sm:$0xff] %v724_v52  ;;  %3961 = vrot.lane.b32.xlu1 %v3960_v51, %s4022_s2  ;;  %v3823_v52 = vld [vmem:[%s4818_s4] sm:$0xff] }
 0x19b   :  { %1066 = vst [vmem:[#allocation1 + $0x23] ss:$4 sm:$0xff] %v725_v53  ;;  %1557 = vmatpush.bf16.msrb.mxu1 %v3823_v52 }
 0x19e   :  { %v1067_v56 = vld.sshfl [vmem:[#allocation1] sm:$0xff pattern:$0x73625140] }
 0x19f   :  { %1097 = vst [vmem:[#allocation1] ss:$4 sm:$0xff] %v727_v55  ;;  %v756_v55 = vld [vmem:[#allocation2 + $0x45] sm:$0x3] }
 0x1a0   :  { %1099 = vst [vmem:[#allocation1 + $0x1] ss:$4 sm:$0xff] %v728_v57 }
 0x1a1   :  { %1101 = vst [vmem:[#allocation1 + $0x2] ss:$4 sm:$0xff] %v729_v58 }
 0x1a2   :  { %v1068_v62 = vld.sshfl [vmem:[#allocation1 + $0x20] sm:$0xff pattern:$0x73625140]  ;;  %1103 = vst [vmem:[#allocation1 + $0x3] ss:$4 sm:$0xff] %v730_v59 }
 0x1a3   :  { %1105 = vst [vmem:[#allocation1 + $0x20] ss:$4 sm:$0xff] %v731_v61  ;;  %v3975_v2 = vpack.i.bf16 %v1068_v62, %v1067_v56  ;;  %v758_v56 = vld [vmem:[#allocation2 + $0x4d] sm:$0x3]  ;;  %v757_v61 = vld [vmem:[#allocation2 + $0x49] sm:$0x3] }
 0x1a4   :  { %1107 = vst [vmem:[#allocation1 + $0x21] ss:$4 sm:$0xff] %v732_v63  ;;  %v3838_v63 = vld [vmem:[%s4818_s4 + $0x78] sm:$0xff] }
 0x1a5   :  { %1109 = vst [vmem:[#allocation1 + $0x22] ss:$4 sm:$0xff] %v733_v3  ;;  %3976 = vrot.lane.b32.xlu0 %v3975_v2, %s4022_s2  ;;  %v760_v2 = vld [vmem:[#allocation2 + $0xe] sm:$0x3]  ;;  %1569 = vmatpush.bf16.msrb.mxu2 %v3838_v63  ;;  %v761_v3 = vld [vmem:[#allocation2 + $0x12] sm:$0x3] }
 0x1a6   :  { %1111 = vst [vmem:[#allocation1 + $0x23] ss:$4 sm:$0xff] %v734_v0  ;;  %v3858_v0 = vld [vmem:[%s4818_s4 + $0x118] sm:$0xff] }
 0x1a7   :  { %1630 = vmatpush.bf16.msra.mxu1 %v3858_v0 }
 0x1a9   :  { %v4410_v8 = vld.sshfl [vmem:[#allocation1] sm:$0xff pattern:$0x73625140] }
 0x1aa   :  { %1114 = vst [vmem:[#allocation1] ss:$4 sm:$0xff] %v735_v5  ;;  %v3857_v5 = vld [vmem:[%s4818_s4 + $0x110] sm:$0xff] }
 0x1ab   :  { %1115 = vst [vmem:[#allocation1 + $0x1] ss:$4 sm:$0xff] %v736_v9  ;;  %v762_v9 = vld [vmem:[#allocation2 + $0x16] sm:$0x3]  ;;  %1631 = vmatpush.bf16.msra.mxu1 %v3857_v5 }
 0x1ac   :  { %1116 = vst [vmem:[#allocation1 + $0x2] ss:$4 sm:$0xff] %v737_v13  ;;  %v3846_v13 = vld [vmem:[%s4818_s4 + $0xb8] sm:$0xff] }
 0x1ad   :  { %v4415_v19 = vld.sshfl [vmem:[#allocation1 + $0x20] sm:$0xff pattern:$0x73625140]  ;;  %1117 = vst [vmem:[#allocation1 + $0x3] ss:$4 sm:$0xff] %v738_v14  ;;  %1588 = vmatpush.bf16.msrb.mxu3 %v3846_v13 }
 0x1ae   :  { %1118 = vst [vmem:[#allocation1 + $0x20] ss:$4 sm:$0xff] %v739_v16  ;;  %v763_v14 = vld [vmem:[#allocation2 + $0x1a] sm:$0x3]  ;;  %v3970_v16 = vpack.i.bf16 %v4395_v17, %v4393_v10 }
 0x1af   :  { %1119 = vst [vmem:[#allocation1 + $0x21] ss:$4 sm:$0xff] %v740_v18  ;;  %v3854_v18 = vld [vmem:[%s4818_s4 + $0xf8] sm:$0xff]  ;;  %v3839_v13 = vld [vmem:[%s4818_s4 + $0x80] sm:$0xff] }
 0x1b0   :  { %1120 = vst [vmem:[#allocation1 + $0x22] ss:$4 sm:$0xff] %v741_v23  ;;  %v3856_v23 = vld [vmem:[%s4818_s4 + $0x108] sm:$0xff]  ;;  %1607 = vmatpush.bf16.msra.mxu0 %v3854_v18  ;;  %v3847_v18 = vld [vmem:[%s4818_s4 + $0xc0] sm:$0xff] }
 0x1b1   :  { %1121 = vst [vmem:[#allocation1 + $0x23] ss:$4 sm:$0xff] %v742_v20  ;;  %v764_v20 = vld [vmem:[#allocation2 + $0x1e] sm:$0x3]  ;;  %1632 = vmatpush.bf16.msra.mxu1 %v3856_v23 }
 0x1b4   :  { %v4423_v26 = vld.sshfl [vmem:[#allocation1] sm:$0xff pattern:$0x73625140]  ;;  %v3947_v47 = vpop.permute.xlu0 %3946  ;;  %1608 = vmatpush.bf16.msra.mxu0 %v3853_v15 }
 0x1b5   :  { %1144 = vst [vmem:[#allocation1] ss:$4 sm:$0xff] %v743_v25  ;;  %v3949_v50 = vunpack.i.h.bf16 %v3947_v47  ;;  %v3948_v51 = vunpack.i.l.bf16 %v3947_v47  ;;  %v3845_v25 = vld [vmem:[%s4818_s4 + $0xb0] sm:$0xff]  ;;  %v771_v47 = vld [vmem:[#allocation2 + $0x42] sm:$0x3] }
 0x1b6   :  { %1146 = vst [vmem:[#allocation1 + $0x1] ss:$4 sm:$0xff] %v744_v28  ;;  %v766_v28 = vld [vmem:[#allocation2 + $0x26] sm:$0x3]  ;;  %1589 = vmatpush.bf16.msrb.mxu3 %v3845_v25 }
 0x1b7   :  { %1148 = vst [vmem:[#allocation1 + $0x2] ss:$4 sm:$0xff] %v745_v30  ;;  %v1230_v58 = vsel %vm390_vm0, %v4367_v60, %v3948_v51  ;;  %v1231_v59 = vsel %vm390_vm0, %v4370_v1, %v3949_v50  ;;  %v759_v60 = vld [vmem:[#allocation2 + $0xa] sm:$0x3]  ;;  %v772_v50 = vld [vmem:[#allocation2 + $0x46] sm:$0x3] }
 0x1b8   :  { %v4428_v36 = vld.sshfl [vmem:[#allocation1 + $0x20] sm:$0xff pattern:$0x73625140]  ;;  %1150 = vst [vmem:[#allocation1 + $0x3] ss:$4 sm:$0xff] %v746_v31  ;;  %v1246_v62 = vpack.c.bf16 %v1231_v59, %v1230_v58  ;;  %v3837_v1 = vld [vmem:[%s4818_s4 + $0x70] sm:$0xff] }
 0x1b9   :  { %1152 = vst [vmem:[#allocation1 + $0x20] ss:$4 sm:$0xff] %v747_v35  ;;  %1570 = vmatpush.bf16.msrb.mxu2 %v3837_v1  ;;  %v765_v31 = vld [vmem:[#allocation2 + $0x22] sm:$0x3]  ;;  %v3835_v35 = vld [vmem:[%s4818_s4 + $0x60] sm:$0xff]  ;;  %v3833_v51 = vld [vmem:[%s4818_s4 + $0x50] sm:$0xff] }
 0x1ba   :  { %1154 = vst [vmem:[#allocation1 + $0x21] ss:$4 sm:$0xff] %v748_v37  ;;  %1558 = vmatmul.bf16.vlgmr.msrb.gmra.mxu1 %v1246_v62  ;;  %1590 = vmatpush.bf16.msrb.mxu3 %v3844_v42  ;;  %v3832_v58 = vld [vmem:[%s4818_s4 + $0x48] sm:$0xff]  ;;  %v3850_v59 = vld [vmem:[%s4818_s4 + $0xd8] sm:$0xff]  ;;  %v3841_v62 = vld [vmem:[%s4818_s4 + $0x90] sm:$0xff] }
 0x1bb   :  { %1156 = vst [vmem:[#allocation1 + $0x22] ss:$4 sm:$0xff] %v749_v40  ;;  %v3855_v40 = vld [vmem:[%s4818_s4 + $0x100] sm:$0xff] }
 0x1bc   :  { %1158 = vst [vmem:[#allocation1 + $0x23] ss:$4 sm:$0xff] %v750_v38  ;;  %1633 = vmatpush.bf16.msra.mxu1 %v3855_v40 }
 0x1bd   :  { %1571 = vmatpush.bf16.msrb.mxu2 %v3836_v21 }
 0x1bf   :  { %v1159_v43 = vld.sshfl [vmem:[#allocation1] sm:$0xff pattern:$0x73625140]  ;;  %v3952_v11 = vpop.permute.xlu0 %3951 }
 0x1c0   :  { %1161 = vst [vmem:[#allocation1] ss:$4 sm:$0xff] %v751_v32  ;;  %v3954_v10 = vunpack.i.h.bf16 %v3952_v11  ;;  %v3953_v17 = vunpack.i.l.bf16 %v3952_v11  ;;  %v768_v32 = vld [vmem:[#allocation2 + $0x36] sm:$0x3] }
 0x1c1   :  { %1162 = vst [vmem:[#allocation1 + $0x1] ss:$4 sm:$0xff] %v752_v45  ;;  %1572 = vmatpush.bf16.msrb.mxu2 %v3835_v35 }
 0x1c2   :  { %1163 = vst [vmem:[#allocation1 + $0x2] ss:$4 sm:$0xff] %v753_v33  ;;  %v1232_v37 = vsel %vm390_vm0, %v4374_v6, %v3953_v17  ;;  %v1233_v38 = vsel %vm390_vm0, %v4377_v12, %v3954_v10  ;;  %v3834_v12 = vld [vmem:[%s4818_s4 + $0x58] sm:$0xff]  ;;  %v770_v33 = vld [vmem:[#allocation2 + $0x3e] sm:$0x3] }
 0x1c3   :  { %v1160_v53 = vld.sshfl [vmem:[#allocation1 + $0x20] sm:$0xff pattern:$0x73625140]  ;;  %1164 = vst [vmem:[#allocation1 + $0x3] ss:$4 sm:$0xff] %v754_v46  ;;  %v1251_v6 = vpack.c.bf16 %v1233_v38, %v1232_v37 }
 0x1c4   :  { %1165 = vst [vmem:[#allocation1 + $0x20] ss:$4 sm:$0xff] %v755_v48  ;;  %v3965_v57 = vpack.i.bf16 %v1160_v53, %v1159_v43  ;;  %v769_v43 = vld [vmem:[#allocation2 + $0x3a] sm:$0x3]  ;;  %v3852_v48 = vld [vmem:[%s4818_s4 + $0xe8] sm:$0xff] }
 0x1c5   :  { %1166 = vst [vmem:[#allocation1 + $0x21] ss:$4 sm:$0xff] %v756_v55  ;;  %v3843_v46 = vld [vmem:[%s4818_s4 + $0xa0] sm:$0xff]  ;;  %1573 = vmatpush.bf16.msrb.mxu2 %v3834_v12  ;;  %1609 = vmatpush.bf16.msra.mxu0 %v3852_v48  ;;  %v774_v55 = vld [vmem:[#allocation2 + $0x4e] sm:$0x3] }
 0x1c6   :  { %1167 = vst [vmem:[#allocation1 + $0x22] ss:$4 sm:$0xff] %v757_v61  ;;  %3966 = vrot.lane.b32.xlu2 %v3965_v57, %s4022_s2  ;;  %v3851_v53 = vld [vmem:[%s4818_s4 + $0xe0] sm:$0xff]  ;;  %1591 = vmatpush.bf16.msrb.mxu3 %v3843_v46  ;;  %v773_v57 = vld [vmem:[#allocation2 + $0x4a] sm:$0x3] }
 0x1c7   :  { %1168 = vst [vmem:[#allocation1 + $0x23] ss:$4 sm:$0xff] %v758_v56  ;;  %v3842_v56 = vld [vmem:[%s4818_s4 + $0x98] sm:$0xff] }
 0x1c8   :  { %v1782_v61 = vld [vmem:[#allocation3] sm:$0x3] }
 0x1c9   :  { %1574 = vmatpush.bf16.msrb.mxu2 %v3833_v51  ;;  %1610 = vmatpush.bf16.msra.mxu0 %v3851_v53 }
 0x1ca   :  { %v1169_v4 = vld.sshfl [vmem:[#allocation1] sm:$0xff pattern:$0x73625140]  ;;  %1563 = vmatmul.bf16.gmra.mxu1 %v1251_v6  ;;  %1592 = vmatpush.bf16.msrb.mxu3 %v3842_v56 }
 0x1cb   :  { %1199 = vst [vmem:[#allocation1] ss:$4 sm:$0xff] %v759_v60  ;;  %v3831_v60 = vld [vmem:[%s4818_s4 + $0x40] sm:$0xff] }
 0x1cc   :  { %1201 = vst [vmem:[#allocation1 + $0x1] ss:$4 sm:$0xff] %v760_v2 }
 0x1cd   :  { %1203 = vst [vmem:[#allocation1 + $0x2] ss:$4 sm:$0xff] %v761_v3  ;;  %1575 = vmatpush.bf16.msrb.mxu2 %v3832_v58  ;;  %1611 = vmatpush.bf16.msra.mxu0 %v3850_v59  ;;  %v3840_v3 = vld [vmem:[%s4818_s4 + $0x88] sm:$0xff] }
 0x1ce   :  { %v1170_v24 = vld.sshfl [vmem:[#allocation1 + $0x20] sm:$0xff pattern:$0x73625140]  ;;  %1205 = vst [vmem:[#allocation1 + $0x3] ss:$4 sm:$0xff] %v762_v9  ;;  %3971 = vrot.lane.b32.xlu2 %v3970_v16, %s4022_s2  ;;  %1593 = vmatpush.bf16.msrb.mxu3 %v3841_v62 }
 0x1cf   :  { %1207 = vst [vmem:[#allocation1 + $0x20] ss:$4 sm:$0xff] %v763_v14  ;;  %v3980_v30 = vpack.i.bf16 %v1170_v24, %v1169_v4  ;;  %v3849_v14 = vld [vmem:[%s4818_s4 + $0xd0] sm:$0xff] }
 0x1d0   :  { %1209 = vst [vmem:[#allocation1 + $0x21] ss:$4 sm:$0xff] %v764_v20 }
 0x1d1   :  { %1211 = vst [vmem:[#allocation1 + $0x22] ss:$4 sm:$0xff] %v765_v31  ;;  %3981 = vrot.lane.b32.xlu1 %v3980_v30, %s4022_s2  ;;  %1576 = vmatpush.bf16.msrb.mxu2 %v3831_v60 }
 0x1d2   :  { %1213 = vst [vmem:[#allocation1 + $0x23] ss:$4 sm:$0xff] %v766_v28  ;;  %1594 = vmatpush.bf16.msrb.mxu3 %v3840_v3  ;;  %1612 = vmatpush.bf16.msra.mxu0 %v3849_v14 }
 0x1d5   :  { %v1214_v45 = vld.sshfl [vmem:[#allocation1] sm:$0xff pattern:$0x73625140] }
 0x1d6   :  { %1216 = vst [vmem:[#allocation1] ss:$4 sm:$0xff] %v767_v29  ;;  %1595 = vmatpush.bf16.msrb.mxu3 %v3839_v13 }
 0x1d7   :  { %1217 = vst [vmem:[#allocation1 + $0x1] ss:$4 sm:$0xff] %v768_v32 }
 0x1d8   :  { %1218 = vst [vmem:[#allocation1 + $0x2] ss:$4 sm:$0xff] %v769_v43 }
 0x1d9   :  { %v1215_v52 = vld.sshfl [vmem:[#allocation1 + $0x20] sm:$0xff pattern:$0x73625140]  ;;  %1219 = vst [vmem:[#allocation1 + $0x3] ss:$4 sm:$0xff] %v770_v33 }
 0x1da   :  { %1220 = vst [vmem:[#allocation1 + $0x20] ss:$4 sm:$0xff] %v771_v47  ;;  %v1250_v11 = vpack.c.bf16 %v1215_v52, %v1214_v45 }
 0x1db   :  { %1221 = vst [vmem:[#allocation1 + $0x21] ss:$4 sm:$0xff] %v772_v50 }
 0x1dc   :  { %1222 = vst [vmem:[#allocation1 + $0x22] ss:$4 sm:$0xff] %v773_v57  ;;  %3487 = vmatmul.msk.bf16.vlgmr.msra.gmra.mxu1 %vm390_vm0, %v1250_v11 }
 0x1dd   :  { %1223 = vst [vmem:[#allocation1 + $0x23] ss:$4 sm:$0xff] %v774_v55 }
 0x1e0   :  { %v1224_v63 = vld.sshfl [vmem:[#allocation1] sm:$0xff pattern:$0x73625140]  ;;  %v3957_v0 = vpop.permute.xlu1 %3956 }
 0x1e1   :  { %1943 = vst [vmem:[#allocation1] ss:$4 sm:$0xff] %v1782_v61  ;;  %v3959_v2 = vunpack.i.h.bf16 %v3957_v0  ;;  %v3958_v1 = vunpack.i.l.bf16 %v3957_v0 }
 0x1e3   :  { %v1234_v4 = vsel %vm390_vm0, %v4383_v41, %v3958_v1  ;;  %v1235_v5 = vsel %vm390_vm0, %v4385_v44, %v3959_v2  ;;  %v3848_v44 = vld [vmem:[%s4818_s4 + $0xc8] sm:$0xff] }
 0x1e4   :  { %v1247_v9 = vpack.c.bf16 %v1235_v5, %v1234_v4  ;;  %v1225_v41 = vld.sshfl [vmem:[#allocation1 + $0x20] sm:$0xff pattern:$0x73625140]  ;;  %1613 = vmatpush.bf16.msra.mxu0 %v3848_v44 }
 0x1e5   :  { %v1255_v16 = vpack.c.bf16 %v1225_v41, %v1224_v63 }
 0x1e6   :  { %1577 = vmatmul.bf16.vlgmr.msrb.gmra.mxu2 %v1247_v9 }
 0x1e8   :  { %1614 = vmatpush.bf16.msra.mxu0 %v3847_v18 }
 0x1ec   :  { %3488 = vmatmul.msk.bf16.gmra.mxu1 %vm390_vm0, %v1255_v16 }
 0x20c   :  { %v3962_v20 = vpop.permute.xlu1 %3961 }
 0x20d   :  { %v3964_v21 = vunpack.i.h.bf16 %v3962_v20  ;;  %v3963_v23 = vunpack.i.l.bf16 %v3962_v20 }
 0x20f   :  { %v1238_v24 = vsel %vm390_vm0, %v4397_v22, %v3963_v23  ;;  %v1239_v10 = vsel %vm390_vm0, %v4399_v27, %v3964_v21 }
 0x210   :  { %v1248_v17 = vpack.c.bf16 %v1239_v10, %v1238_v24 }
 0x212   :  { %1596 = vmatmul.bf16.vlgmr.msrb.gmra.mxu3 %v1248_v17 }
 0x217   :  { %v3977_v25 = vpop.permute.xlu0 %3976 }
 0x218   :  { %v3979_v28 = vunpack.i.h.bf16 %v3977_v25  ;;  %v3978_v30 = vunpack.i.l.bf16 %v3977_v25 }
 0x21a   :  { %v1240_v15 = vsel %vm390_vm0, %v4401_v34, %v3978_v30  ;;  %v1241_v31 = vsel %vm390_vm0, %v4403_v39, %v3979_v28 }
 0x21b   :  { %v1253_v37 = vpack.c.bf16 %v1241_v31, %v1240_v15 }
 0x220   :  { %v3967_v35 = vpop.permute.xlu2 %3966 }
 0x221   :  { %v3969_v38 = vunpack.i.h.bf16 %v3967_v35  ;;  %v3968_v40 = vunpack.i.l.bf16 %v3967_v35 }
 0x222   :  { %1601 = vmatmul.bf16.gmra.mxu3 %v1253_v37 }
 0x223   :  { %v1243_v22 = vsel %vm390_vm0, %v4415_v19, %v3969_v38  ;;  %v1242_v27 = vsel %vm390_vm0, %v4410_v8, %v3968_v40 }
 0x224   :  { %v1249_v42 = vpack.c.bf16 %v1243_v22, %v1242_v27 }
 0x226   :  { %1615 = vmatmul.bf16.vlgmr.msra.gmra.mxu0 %v1249_v42 }
 0x228   :  { %v3972_v29 = vpop.permute.xlu2 %3971 }
 0x229   :  { %v3974_v32 = vunpack.i.h.bf16 %v3972_v29  ;;  %v3973_v43 = vunpack.i.l.bf16 %v3972_v29 }
 0x22b   :  { %v1236_v34 = vsel %vm390_vm0, %v4388_v49, %v3973_v43  ;;  %v1237_v39 = vsel %vm390_vm0, %v4390_v54, %v3974_v32 }
 0x22c   :  { %v1252_v45 = vpack.c.bf16 %v1237_v39, %v1236_v34 }
 0x22e   :  { %1582 = vmatmul.bf16.gmra.mxu2 %v1252_v45 }
 0x237   :  { %v1559_v47 = vpop.f32.mrf.mxu1 }
 0x23f   :  { %v1561_v48 = vpop.f32.mrf.mxu1 }
 0x243   :  { %v3982_v6 = vpop.permute.xlu1 %3981 }
 0x244   :  { %v3984_v12 = vunpack.i.h.bf16 %v3982_v6  ;;  %v3983_v33 = vunpack.i.l.bf16 %v3982_v6 }
 0x246   :  { %v1244_v19 = vsel %vm390_vm0, %v4423_v26, %v3983_v33  ;;  %v1245_v8 = vsel %vm390_vm0, %v4428_v36, %v3984_v12 }
 0x247   :  { %v1254_v46 = vpack.c.bf16 %v1245_v8, %v1244_v19  ;;  %v1564_v50 = vpop.f32.mrf.mxu1 }
 0x249   :  { %1620 = vmatmul.bf16.gmra.mxu0 %v1254_v46 }
 0x24f   :  { %v1566_v49 = vpop.f32.mrf.mxu1 }
 0x259   :  { %v1635_v54 = vpop.f32.mrf.mxu1 }
 0x261   :  { %v1637_v57 = vpop.f32.mrf.mxu1 }
 0x269   :  { %v1578_v51 = vpop.f32.mrf.mxu2  ;;  %v1640_v60 = vpop.f32.mrf.mxu1 }
 0x26a   :  { %v1579_v26 = vadd.f32 %v1578_v51, %v1559_v47 }
 0x271   :  { %v1580_v53 = vpop.f32.mrf.mxu2  ;;  %v1642_v17 = vpop.f32.mrf.mxu1 }
 0x272   :  { %v1581_v61 = vadd.f32 %v1580_v53, %v1561_v48 }
 0x295   :  { %v1597_v52 = vpop.f32.mrf.mxu3 }
 0x296   :  { %v1598_v0 = vadd.f32 %v1597_v52, %v1579_v26  ;;  %v1645_v52 = vld [vmem:[%s4819_s5] sm:$0x1] }
 0x29d   :  { %v1599_v56 = vpop.f32.mrf.mxu3 }
 0x29e   :  { %v1600_v62 = vadd.f32 %v1599_v56, %v1581_v61 }
 0x2a3   :  { %v1616_v55 = vpop.f32.mrf.mxu0 }
 0x2a4   :  { %v1617_v5 = vadd.f32 %v1616_v55, %v1598_v0 }
 0x2a5   :  { %v1602_v36 = vpop.f32.mrf.mxu3 }
 0x2a6   :  { %v1636_v14 = vadd.f32 %v1635_v54, %v1617_v5 }
 0x2a8   :  { %v1657_v21 = vmul.f32 %v1636_v14, %v1636_v14 }
 0x2ab   :  { %v1618_v59 = vpop.f32.mrf.mxu0 }
 0x2ac   :  { %v1619_v2 = vadd.f32 %v1618_v59, %v1600_v62 }
 0x2ad   :  { %v1604_v44 = vpop.f32.mrf.mxu3 }
 0x2ae   :  { %v1638_v11 = vadd.f32 %v1637_v57, %v1619_v2 }
 0x2b0   :  { %v1658_v16 = vmul.f32 %v1638_v11, %v1638_v11  ;;  %v1647_v23 = vadd.f32 %v1638_v11, %v1636_v14 }
 0x2b1   :  { %v1583_v58 = vpop.f32.mrf.mxu2 }
 0x2b2   :  { %v1584_v63 = vadd.f32 %v1583_v58, %v1564_v50  ;;  %v1661_v25 = vadd.f32 %v1658_v16, %v1657_v21 }
 0x2b4   :  { %v1603_v1 = vadd.f32 %v1602_v36, %v1584_v63  ;;  %v3985_v63 = vld [vmem:[%s4821_s7] ss:$0 sm:$0xff] }
 0x2b9   :  { %v1585_v3 = vpop.f32.mrf.mxu2 }
 0x2ba   :  { %v1586_v13 = vadd.f32 %v1585_v3, %v1566_v49 }
 0x2bc   :  { %v1605_v18 = vadd.f32 %v1604_v44, %v1586_v13 }
 0x2c6   :  { %v1621_v4 = vpop.f32.mrf.mxu0 }
 0x2c7   :  { %v1622_v9 = vadd.f32 %v1621_v4, %v1603_v1 }
 0x2c9   :  { %v1641_v41 = vadd.f32 %v1640_v60, %v1622_v9 }
 0x2cb   :  { %v1659_v24 = vmul.f32 %v1641_v41, %v1641_v41  ;;  %v1648_v28 = vadd.f32 %v1647_v23, %v1641_v41 }
 0x2cd   :  { %v1662_v15 = vadd.f32 %v1661_v25, %v1659_v24 }
 0x2ce   :  { %v1623_v20 = vpop.f32.mrf.mxu0 }
 0x2cf   :  { %v1624_v10 = vadd.f32 %v1623_v20, %v1605_v18 }
 0x2d1   :  { %v1643_v30 = vadd.f32 %v1642_v17, %v1624_v10 }
 0x2d3   :  { %v1649_v31 = vadd.f32 %v1648_v28, %v1643_v30  ;;  %v1660_v35 = vmul.f32 %v1643_v30, %v1643_v30 }
 0x2d5   :  { %v1650_v37 = vrot.slane %v1649_v31, 4  ;;  %v1663_v38 = vadd.f32 %v1662_v15, %v1660_v35 }
 0x2d7   :  { %v1651_v40 = vadd.f32 %v1650_v37, %v1649_v31  ;;  %v1664_v22 = vrot.slane %v1663_v38, 4 }
 0x2d9   :  { %v1652_v27 = vrot.slane %v1651_v40, 2  ;;  %v1665_v42 = vadd.f32 %v1664_v22, %v1663_v38  ;;  %v3866_v38 = vld [vmem:[%s4822_s8 + $0x38] sm:$0xff] }
 0x2da   :  { %v3874_v22 = vld [vmem:[%s4822_s8 + $0x78] sm:$0xff]  ;;  %2948 = vmatpush.bf16.msra.mxu2 %v3866_v38 }
 0x2db   :  { %v1653_v29 = vadd.f32 %v1652_v27, %v1651_v40  ;;  %v1666_v32 = vrot.slane %v1665_v42, 2  ;;  %2967 = vmatpush.bf16.msra.mxu3 %v3874_v22  ;;  %v3898_v22 = vld [vmem:[%s4822_s8 + $0x138] sm:$0xff] }
 0x2dd   :  { %v1654_v43 = vrot.slane %v1653_v29, 1  ;;  %v1667_v34 = vadd.f32 %v1666_v32, %v1665_v42  ;;  %v3865_v42 = vld [vmem:[%s4822_s8 + $0x30] sm:$0xff] }
 0x2de   :  { %v3873_v32 = vld [vmem:[%s4822_s8 + $0x70] sm:$0xff]  ;;  %2949 = vmatpush.bf16.msra.mxu2 %v3865_v42 }
 0x2df   :  { %v1655_v39 = vadd.f32 %v1654_v43, %v1653_v29  ;;  %v1668_v45 = vrot.slane %v1667_v34, 1  ;;  %v3864_v43 = vld [vmem:[%s4822_s8 + $0x28] sm:$0xff]  ;;  %2968 = vmatpush.bf16.msra.mxu3 %v3873_v32 }
 0x2e1   :  { %v1656_v6 = vmul.f32 %v1655_v39, %v4284_v7  ;;  %v1669_v12 = vadd.f32 %v1668_v45, %v1667_v34  ;;  %v1790_v34 = vld [vmem:[#allocation3 + $0x28] sm:$0x3]  ;;  %v3872_v39 = vld [vmem:[%s4822_s8 + $0x68] sm:$0xff] }
 0x2e2   :  { %2950 = vmatpush.bf16.msra.mxu2 %v3864_v43 }
 0x2e3   :  { %v1670_v33 = vmul.f32 %v1669_v12, %v4284_v7  ;;  %v1671_v19 = vmul.f32 %v1656_v6, %v1656_v6  ;;  %v1646_v7 = vld [vmem:[%s4820_s6] sm:$0x1]  ;;  %2969 = vmatpush.bf16.msra.mxu3 %v3872_v39 }
 0x2e4   :  { %v3863_v12 = vld [vmem:[%s4822_s8 + $0x20] sm:$0xff] }
 0x2e5   :  { %v1672_v8 = vsub.f32 %v1670_v33, %v1671_v19  ;;  %v3882_v33 = vld [vmem:[%s4822_s8 + $0xb8] sm:$0xff] }
 0x2e6   :  { %2986 = vmatpush.bf16.msrb.mxu0 %v3882_v33  ;;  %2951 = vmatpush.bf16.msra.mxu2 %v3863_v12 }
 0x2e7   :  { %v1673_v46 = vadd.f32 1e-05, %v1672_v8  ;;  %v3871_v8 = vld [vmem:[%s4822_s8 + $0x60] sm:$0xff] }
 0x2e8   :  { %2970 = vmatpush.bf16.msra.mxu3 %v3871_v8  ;;  %v3896_v8 = vld [vmem:[%s4822_s8 + $0x128] sm:$0xff] }
 0x2e9   :  { %3992 = vrsqrt.f32 %v1673_v46  ;;  %vm1680_vm8 = vweird.f32 %v1673_v46 }
 0x2ef   :  { %v3993_v47 = vpop.eup %3992 }
 0x2f0   :  { %v1675_v48 = vmul.f32 %v3993_v47, %v1673_v46  ;;  %vm1681_vm7 = vweird.f32 %v3993_v47 }
 0x2f1   :  { %vm1682_vm9 = vmor %vm1680_vm8, %vm1681_vm7 }
 0x2f2   :  { %v1676_v50 = vmul.f32 %v3993_v47, %v1675_v48 }
 0x2f4   :  { %v1677_v49 = vmul.f32 0.5, %v1676_v50 }
 0x2f6   :  { %v1678_v51 = vsub.f32 1.5, %v1677_v49  ;;  %v3862_v49 = vld [vmem:[%s4822_s8 + $0x18] sm:$0xff] }
 0x2f7   :  { %2952 = vmatpush.bf16.msra.mxu2 %v3862_v49  ;;  %v3883_v49 = vld [vmem:[%s4822_s8 + $0xc0] sm:$0xff] }
 0x2f8   :  { %v1679_v54 = vmul.f32 %v3993_v47, %v1678_v51  ;;  %v3881_v51 = vld [vmem:[%s4822_s8 + $0xb0] sm:$0xff] }
 0x2f9   :  { %2987 = vmatpush.bf16.msrb.mxu0 %v3881_v51  ;;  %v3895_v51 = vld [vmem:[%s4822_s8 + $0x120] sm:$0xff] }
 0x2fa   :  { %v1683_v53 = vsel %vm1682_vm9, %v3993_v47, %v1679_v54  ;;  %v3870_v54 = vld [vmem:[%s4822_s8 + $0x58] sm:$0xff] }
 0x2fb   :  { %v1684_v55 = vmul.f32 %v1683_v53, %v1645_v52  ;;  %2971 = vmatpush.bf16.msra.mxu3 %v3870_v54 }
 0x2fd   :  { %v1692_v56 = vmul.f32 %v1684_v55, %v1656_v6  ;;  %v1686_v57 = vperm.slane %v1684_v55, 0  ;;  %v1798_v55 = vld [vmem:[#allocation3 + $0x1] sm:$0x3] }
 0x2ff   :  { %v1693_v58 = vsub.f32 %v1646_v7, %v1692_v56  ;;  %v1688_v59 = vmul.f32 %v1686_v57, %v1636_v14  ;;  %v1689_v61 = vmul.f32 %v1686_v57, %v1638_v11  ;;  %v1690_v26 = vmul.f32 %v1686_v57, %v1641_v41  ;;  %v3861_v7 = vld [vmem:[%s4822_s8 + $0x10] sm:$0xff]  ;;  %v3880_v56 = vld [vmem:[%s4822_s8 + $0xa8] sm:$0xff] }
 0x300   :  { %v1691_v2 = vmul.f32 %v1686_v57, %v1643_v30  ;;  %v3869_v57 = vld [vmem:[%s4822_s8 + $0x50] sm:$0xff]  ;;  %2988 = vmatpush.bf16.msrb.mxu0 %v3880_v56  ;;  %2953 = vmatpush.bf16.msra.mxu2 %v3861_v7 }
 0x301   :  { %v1695_v62 = vperm.slane %v1693_v58, 0  ;;  %2972 = vmatpush.bf16.msra.mxu3 %v3869_v57  ;;  %v3894_v57 = vld [vmem:[%s4822_s8 + $0x118] sm:$0xff] }
 0x303   :  { %v1697_v36 = vadd.f32 %v1695_v62, %v1688_v59  ;;  %v1698_v0 = vadd.f32 %v1695_v62, %v1689_v61  ;;  %v1699_v60 = vadd.f32 %v1695_v62, %v1690_v26  ;;  %v1700_v4 = vadd.f32 %v1695_v62, %v1691_v2  ;;  %v3860_v62 = vld [vmem:[%s4822_s8 + $0x8] sm:$0xff] }
 0x304   :  { %2954 = vmatpush.bf16.msra.mxu2 %v3860_v62  ;;  %v3905_v62 = vld [vmem:[%s4822_s8 + $0x170] sm:$0xff] }
 0x305   :  { %vm1702_vm10 = vcmp.gt.f32.partialorder %v1697_v36, 0.0  ;;  %vm1703_vm11 = vcmp.gt.f32.partialorder %v1698_v0, 0.0  ;;  %v1709_v1 = vmul.f32 %v3985_v63, %v1697_v36  ;;  %v1710_v3 = vmul.f32 %v3985_v63, %v1698_v0 }
 0x306   :  { %v1711_v5 = vmul.f32 %v3985_v63, %v1699_v60  ;;  %vm1704_vm12 = vcmp.gt.f32.partialorder %v1699_v60, 0.0  ;;  %v1712_v16 = vmul.f32 %v3985_v63, %v1700_v4  ;;  %vm1705_vm13 = vcmp.gt.f32.partialorder %v1700_v4, 0.0  ;;  %v3879_v63 = vld [vmem:[%s4822_s8 + $0xa0] sm:$0xff] }
 0x307   :  { %v1713_v9 = vsel %vm1702_vm10, %v1697_v36, %v1709_v1  ;;  %v1714_v13 = vsel %vm1703_vm11, %v1698_v0, %v1710_v3  ;;  %v3868_v0 = vld [vmem:[%s4822_s8 + $0x48] sm:$0xff]  ;;  %2989 = vmatpush.bf16.msrb.mxu0 %v3879_v63  ;;  %v3859_v3 = vld [vmem:[%s4822_s8] sm:$0xff] }
 0x308   :  { %v1741_v11 = vrot.slane %v1713_v9, 2  ;;  %v1742_v14 = vrot.slane %v1713_v9, 4  ;;  %v1743_v41 = vrot.slane %v1713_v9, 6  ;;  %1766 = vst [vmem:[#allocation3 + $0x5] sm:$0x3] %v1713_v9  ;;  %v1744_v44 = vrot.slane %v1714_v13, 2  ;;  %2973 = vmatpush.bf16.msra.mxu3 %v3868_v0  ;;  %2955 = vmatpush.bf16.msra.mxu2 %v3859_v3 }
 0x309   :  { %1770 = vst [vmem:[#allocation3 + $0x15] sm:$0x3] %v1714_v13  ;;  %v1715_v18 = vsel %vm1704_vm12, %v1699_v60, %v1711_v5  ;;  %v1745_v20 = vrot.slane %v1714_v13, 4  ;;  %v1746_v21 = vrot.slane %v1714_v13, 6  ;;  %v1716_v24 = vsel %vm1705_vm13, %v1700_v4, %v1712_v16  ;;  %v3878_v4 = vld [vmem:[%s4822_s8 + $0x98] sm:$0xff]  ;;  %v3867_v13 = vld [vmem:[%s4822_s8 + $0x40] sm:$0xff] }
 0x30a   :  { %1767 = vst [vmem:[#allocation3 + $0x9] sm:$0x3] %v1741_v11  ;;  %v1747_v23 = vrot.slane %v1715_v18, 2  ;;  %v1748_v10 = vrot.slane %v1715_v18, 4  ;;  %v1749_v17 = vrot.slane %v1715_v18, 6  ;;  %v1750_v25 = vrot.slane %v1716_v24, 2 }
 0x30b   :  { %1768 = vst [vmem:[#allocation3 + $0xd] sm:$0x3] %v1742_v14  ;;  %v1751_v28 = vrot.slane %v1716_v24, 4  ;;  %v1752_v30 = vrot.slane %v1716_v24, 6  ;;  %v3890_v5 = vld [vmem:[%s4822_s8 + $0xf8] sm:$0xff]  ;;  %2990 = vmatpush.bf16.msrb.mxu0 %v3878_v4 }
 0x30c   :  { %1769 = vst [vmem:[#allocation3 + $0x11] sm:$0x3] %v1743_v41  ;;  %3005 = vmatpush.bf16.msrb.mxu1 %v3890_v5  ;;  %v1806_v11 = vld [vmem:[#allocation3 + $0x29] sm:$0x3]  ;;  %v3877_v41 = vld [vmem:[%s4822_s8 + $0x90] sm:$0xff]  ;;  %2974 = vmatpush.bf16.msra.mxu3 %v3867_v13 }
 0x30d   :  { %1771 = vst [vmem:[#allocation3 + $0x19] sm:$0x3] %v1744_v44  ;;  %v3889_v44 = vld [vmem:[%s4822_s8 + $0xf0] sm:$0xff]  ;;  %3024 = vmatpush.bf16.msrb.mxu2 %v3898_v22  ;;  %v3911_v22 = vld [vmem:[%s4822_s8 + $0x1a0] sm:$0xff] }
 0x30e   :  { %1772 = vst [vmem:[#allocation3 + $0x1d] sm:$0x3] %v1745_v20 }
 0x30f   :  { %1773 = vst [vmem:[#allocation3 + $0x21] sm:$0x3] %v1746_v21  ;;  %v1783_v15 = vld [vmem:[#allocation3 + $0x4] sm:$0x3]  ;;  %2991 = vmatpush.bf16.msrb.mxu0 %v3877_v41 }
 0x310   :  { %1774 = vst [vmem:[#allocation3 + $0x2d] sm:$0x3] %v1715_v18  ;;  %v1787_v40 = vld [vmem:[#allocation3 + $0x14] sm:$0x3]  ;;  %v1799_v59 = vld [vmem:[#allocation3 + $0x5] sm:$0x3]  ;;  %3006 = vmatpush.bf16.msrb.mxu1 %v3889_v44 }
 0x311   :  { %1775 = vst [vmem:[#allocation3 + $0x31] sm:$0x3] %v1747_v23  ;;  %v1784_v31 = vld [vmem:[#allocation3 + $0x8] sm:$0x3]  ;;  %v1803_v2 = vld [vmem:[#allocation3 + $0x15] sm:$0x3] }
 0x312   :  { %1776 = vst [vmem:[#allocation3 + $0x35] sm:$0x3] %v1748_v10  ;;  %v1785_v35 = vld [vmem:[#allocation3 + $0xc] sm:$0x3]  ;;  %v1800_v61 = vld [vmem:[#allocation3 + $0x9] sm:$0x3] }
 0x313   :  { %1777 = vst [vmem:[#allocation3 + $0x39] sm:$0x3] %v1749_v17  ;;  %v1786_v37 = vld [vmem:[#allocation3 + $0x10] sm:$0x3]  ;;  %v1801_v26 = vld [vmem:[#allocation3 + $0xd] sm:$0x3] }
 0x314   :  { %1778 = vst [vmem:[#allocation3 + $0x3d] sm:$0x3] %v1716_v24  ;;  %v1788_v27 = vld [vmem:[#allocation3 + $0x18] sm:$0x3]  ;;  %v1802_v36 = vld [vmem:[#allocation3 + $0x11] sm:$0x3] }
 0x315   :  { %1779 = vst [vmem:[#allocation3 + $0x41] sm:$0x3] %v1750_v25  ;;  %v1789_v29 = vld [vmem:[#allocation3 + $0x1c] sm:$0x3]  ;;  %v1804_v1 = vld [vmem:[#allocation3 + $0x19] sm:$0x3] }
 0x316   :  { %1780 = vst [vmem:[#allocation3 + $0x45] sm:$0x3] %v1751_v28  ;;  %v1805_v9 = vld [vmem:[#allocation3 + $0x1d] sm:$0x3]  ;;  %v3876_v24 = vld [vmem:[%s4822_s8 + $0x88] sm:$0xff]  ;;  %v3902_v44 = vld [vmem:[%s4822_s8 + $0x158] sm:$0xff] }
 0x317   :  { %1781 = vst [vmem:[#allocation3 + $0x49] sm:$0x3] %v1752_v30  ;;  %v1791_v6 = vld [vmem:[#allocation3 + $0x2c] sm:$0x3]  ;;  %v3888_v10 = vld [vmem:[%s4822_s8 + $0xe8] sm:$0xff]  ;;  %2992 = vmatpush.bf16.msrb.mxu0 %v3876_v24 }
 0x318   :  { %1945 = vst [vmem:[#allocation1 + $0x1] ss:$4 sm:$0xff] %v1783_v15  ;;  %v1792_v19 = vld [vmem:[#allocation3 + $0x30] sm:$0x3]  ;;  %v1807_v18 = vld [vmem:[#allocation3 + $0x2d] sm:$0x3]  ;;  %3007 = vmatpush.bf16.msrb.mxu1 %v3888_v10 }
 0x319   :  { %1947 = vst [vmem:[#allocation1 + $0x2] ss:$4 sm:$0xff] %v1784_v31  ;;  %v1793_v46 = vld [vmem:[#allocation3 + $0x34] sm:$0x3]  ;;  %v1808_v20 = vld [vmem:[#allocation3 + $0x31] sm:$0x3] }
 0x31a   :  { %1949 = vst [vmem:[#allocation1 + $0x3] ss:$4 sm:$0xff] %v1785_v35  ;;  %v1794_v47 = vld [vmem:[#allocation3 + $0x38] sm:$0x3]  ;;  %v1809_v21 = vld [vmem:[#allocation3 + $0x35] sm:$0x3] }
 0x31b   :  { %1951 = vst [vmem:[#allocation1 + $0x20] ss:$4 sm:$0xff] %v1786_v37  ;;  %v1795_v50 = vld [vmem:[#allocation3 + $0x3c] sm:$0x3]  ;;  %v1810_v23 = vld [vmem:[#allocation3 + $0x39] sm:$0x3] }
 0x31c   :  { %1953 = vst [vmem:[#allocation1 + $0x21] ss:$4 sm:$0xff] %v1787_v40  ;;  %v1796_v52 = vld [vmem:[#allocation3 + $0x40] sm:$0x3]  ;;  %v1811_v25 = vld [vmem:[#allocation3 + $0x3d] sm:$0x3] }
 0x31d   :  { %1955 = vst [vmem:[#allocation1 + $0x22] ss:$4 sm:$0xff] %v1788_v27  ;;  %v1797_v53 = vld [vmem:[#allocation3 + $0x44] sm:$0x3]  ;;  %v1812_v30 = vld [vmem:[#allocation3 + $0x41] sm:$0x3] }
 0x31e   :  { %1957 = vst [vmem:[#allocation1 + $0x23] ss:$4 sm:$0xff] %v1789_v29  ;;  %v1813_v15 = vld [vmem:[#allocation3 + $0x45] sm:$0x3]  ;;  %v3875_v31 = vld [vmem:[%s4822_s8 + $0x80] sm:$0xff]  ;;  %v3901_v10 = vld [vmem:[%s4822_s8 + $0x150] sm:$0xff] }
 0x31f   :  { %v3887_v35 = vld [vmem:[%s4822_s8 + $0xe0] sm:$0xff]  ;;  %v1814_v37 = vld [vmem:[#allocation3 + $0x2] sm:$0x3]  ;;  %2993 = vmatpush.bf16.msrb.mxu0 %v3875_v31  ;;  %v1815_v27 = vld [vmem:[#allocation3 + $0x6] sm:$0x3] }
 0x320   :  { %3008 = vmatpush.bf16.msrb.mxu1 %v3887_v35  ;;  %v3886_v40 = vld [vmem:[%s4822_s8 + $0xd8] sm:$0xff]  ;;  %v1816_v42 = vld [vmem:[#allocation3 + $0xa] sm:$0x3]  ;;  %v1817_v29 = vld [vmem:[#allocation3 + $0xe] sm:$0x3] }
 0x321   :  { %v4591_v45 = vld.sshfl [vmem:[#allocation1] sm:$0xff pattern:$0x73625140]  ;;  %v1818_v32 = vld [vmem:[#allocation3 + $0x12] sm:$0x3] }
 0x322   :  { %1960 = vst [vmem:[#allocation1] ss:$4 sm:$0xff] %v1790_v34  ;;  %v3885_v34 = vld [vmem:[%s4822_s8 + $0xd0] sm:$0xff]  ;;  %v1819_v39 = vld [vmem:[#allocation3 + $0x16] sm:$0x3] }
 0x323   :  { %1961 = vst [vmem:[#allocation1 + $0x1] ss:$4 sm:$0xff] %v1791_v6  ;;  %v3897_v6 = vld [vmem:[%s4822_s8 + $0x130] sm:$0xff]  ;;  %v1825_v54 = vld [vmem:[#allocation3 + $0x36] sm:$0x3] }
 0x324   :  { %1962 = vst [vmem:[#allocation1 + $0x2] ss:$4 sm:$0xff] %v1792_v19  ;;  %3009 = vmatpush.bf16.msrb.mxu1 %v3886_v40  ;;  %v1820_v12 = vld [vmem:[#allocation3 + $0x1a] sm:$0x3]  ;;  %v1821_v33 = vld [vmem:[#allocation3 + $0x1e] sm:$0x3]  ;;  %3025 = vmatpush.bf16.msrb.mxu2 %v3897_v6 }
 0x325   :  { %v4602_v48 = vld.sshfl [vmem:[#allocation1 + $0x20] sm:$0xff pattern:$0x73625140]  ;;  %1963 = vst [vmem:[#allocation1 + $0x3] ss:$4 sm:$0xff] %v1793_v46  ;;  %v3884_v19 = vld [vmem:[%s4822_s8 + $0xc8] sm:$0xff] }
 0x326   :  { %1964 = vst [vmem:[#allocation1 + $0x20] ss:$4 sm:$0xff] %v1794_v47  ;;  %v2350_v14 = vpack.c.bf16 %v4602_v48, %v4591_v45  ;;  %v1822_v46 = vld [vmem:[#allocation3 + $0x2a] sm:$0x3]  ;;  %v1827_v7 = vld [vmem:[#allocation3 + $0x3e] sm:$0x3] }
 0x327   :  { %1965 = vst [vmem:[#allocation1 + $0x21] ss:$4 sm:$0xff] %v1795_v50  ;;  %v1823_v50 = vld [vmem:[#allocation3 + $0x2e] sm:$0x3]  ;;  %v1830_v63 = vld [vmem:[#allocation3 + $0x4] sm:$0x3] }
 0x328   :  { %1966 = vst [vmem:[#allocation1 + $0x22] ss:$4 sm:$0xff] %v1796_v52  ;;  %2956 = vmatmul.bf16.vlgmr.msra.gmra.mxu2 %v2350_v14  ;;  %3010 = vmatpush.bf16.msrb.mxu1 %v3885_v34  ;;  %v1824_v52 = vld [vmem:[#allocation3 + $0x32] sm:$0x3]  ;;  %v1831_v0 = vld [vmem:[#allocation3 + $0x8] sm:$0x3] }
 0x329   :  { %1967 = vst [vmem:[#allocation1 + $0x23] ss:$4 sm:$0xff] %v1797_v53  ;;  %3026 = vmatpush.bf16.msrb.mxu2 %v3896_v8  ;;  %v1826_v53 = vld [vmem:[#allocation3 + $0x3a] sm:$0x3]  ;;  %v1833_v3 = vld [vmem:[#allocation3 + $0x10] sm:$0x3] }
 0x32a   :  { %v1834_v4 = vld [vmem:[#allocation3 + $0x14] sm:$0x3]  ;;  %v1836_v13 = vld [vmem:[#allocation3 + $0x1c] sm:$0x3]  ;;  %v3903_v14 = vld [vmem:[%s4822_s8 + $0x160] sm:$0xff] }
 0x32b   :  { %v1837_v41 = vld [vmem:[#allocation3 + $0x20] sm:$0x3]  ;;  %v1839_v24 = vld [vmem:[#allocation3 + $0x30] sm:$0x3]  ;;  %v1845_v40 = vld [vmem:[#allocation3 + $0x48] sm:$0x3] }
 0x32c   :  { %v4622_v58 = vld.sshfl [vmem:[#allocation1] sm:$0xff pattern:$0x73625140]  ;;  %3011 = vmatpush.bf16.msrb.mxu1 %v3884_v19  ;;  %v1843_v31 = vld [vmem:[#allocation3 + $0x40] sm:$0x3] }
 0x32d   :  { %1990 = vst [vmem:[#allocation1] ss:$4 sm:$0xff] %v1798_v55  ;;  %3027 = vmatpush.bf16.msrb.mxu2 %v3895_v51  ;;  %v1849_v34 = vld [vmem:[#allocation3 + $0x11] sm:$0x3]  ;;  %v1851_v6 = vld [vmem:[#allocation3 + $0x19] sm:$0x3] }
 0x32e   :  { %1992 = vst [vmem:[#allocation1 + $0x1] ss:$4 sm:$0xff] %v1799_v59  ;;  %v1828_v59 = vld [vmem:[#allocation3 + $0x42] sm:$0x3]  ;;  %v1855_v51 = vld [vmem:[#allocation3 + $0x31] sm:$0x3] }
 0x32f   :  { %1994 = vst [vmem:[#allocation1 + $0x2] ss:$4 sm:$0xff] %v1800_v61  ;;  %v1829_v61 = vld [vmem:[#allocation3 + $0x46] sm:$0x3] }
 0x330   :  { %v4633_v60 = vld.sshfl [vmem:[#allocation1 + $0x20] sm:$0xff pattern:$0x73625140]  ;;  %1996 = vst [vmem:[#allocation1 + $0x3] ss:$4 sm:$0xff] %v1801_v26  ;;  %3012 = vmatpush.bf16.msrb.mxu1 %v3883_v49  ;;  %v3893_v26 = vld [vmem:[%s4822_s8 + $0x110] sm:$0xff] }
 0x331   :  { %1998 = vst [vmem:[#allocation1 + $0x20] ss:$4 sm:$0xff] %v1802_v36  ;;  %v2359_v45 = vpack.c.bf16 %v4633_v60, %v4622_v58  ;;  %v3906_v58 = vld [vmem:[%s4822_s8 + $0x178] sm:$0xff]  ;;  %3028 = vmatpush.bf16.msrb.mxu2 %v3894_v57  ;;  %v1832_v60 = vld [vmem:[#allocation3 + $0xc] sm:$0x3]  ;;  %v3921_v49 = vld [vmem:[%s4822_s8 + $0x1f0] sm:$0xff] }
 0x332   :  { %2000 = vst [vmem:[#allocation1 + $0x21] ss:$4 sm:$0xff] %v1803_v2  ;;  %3043 = vmatpush.bf16.msrb.mxu3 %v3906_v58  ;;  %v3892_v2 = vld [vmem:[%s4822_s8 + $0x108] sm:$0xff]  ;;  %v3910_v19 = vld [vmem:[%s4822_s8 + $0x198] sm:$0xff] }
 0x333   :  { %2002 = vst [vmem:[#allocation1 + $0x22] ss:$4 sm:$0xff] %v1804_v1  ;;  %v3904_v1 = vld [vmem:[%s4822_s8 + $0x168] sm:$0xff]  ;;  %v3922_v8 = vld [vmem:[%s4822_s8 + $0x1f8] sm:$0xff] }
 0x334   :  { %2004 = vst [vmem:[#allocation1 + $0x23] ss:$4 sm:$0xff] %v1805_v9  ;;  %v1835_v9 = vld [vmem:[#allocation3 + $0x18] sm:$0x3]  ;;  %3081 = vmatpush.bf16.msra.mxu1 %v3922_v8  ;;  %v1859_v57 = vld [vmem:[#allocation3 + $0x41] sm:$0x3] }
 0x335   :  { %3029 = vmatpush.bf16.msrb.mxu2 %v3893_v26  ;;  %v3907_v26 = vld [vmem:[%s4822_s8 + $0x180] sm:$0xff]  ;;  %v1888_v8 = vld [vmem:[#allocation3 + $0x34] sm:$0x3] }
 0x336   :  { %3044 = vmatpush.bf16.msrb.mxu3 %v3905_v62  ;;  %v3919_v62 = vld [vmem:[%s4822_s8 + $0x1e0] sm:$0xff] }
 0x337   :  { %v2005_v16 = vld.sshfl [vmem:[#allocation1] sm:$0xff pattern:$0x73625140] }
 0x338   :  { %2007 = vst [vmem:[#allocation1] ss:$4 sm:$0xff] %v1806_v11  ;;  %2961 = vmatmul.bf16.gmra.mxu2 %v2359_v45  ;;  %v3891_v11 = vld [vmem:[%s4822_s8 + $0x100] sm:$0xff]  ;;  %3082 = vmatpush.bf16.msra.mxu1 %v3921_v49 }
 0x339   :  { %2008 = vst [vmem:[#allocation1 + $0x1] ss:$4 sm:$0xff] %v1807_v18  ;;  %3030 = vmatpush.bf16.msrb.mxu2 %v3892_v2  ;;  %v1865_v2 = vld [vmem:[#allocation3 + $0x12] sm:$0x3] }
 0x33a   :  { %2009 = vst [vmem:[#allocation1 + $0x2] ss:$4 sm:$0xff] %v1808_v20  ;;  %3045 = vmatpush.bf16.msrb.mxu3 %v3904_v1  ;;  %v1838_v20 = vld [vmem:[#allocation3 + $0x2c] sm:$0x3]  ;;  %v1866_v1 = vld [vmem:[#allocation3 + $0x16] sm:$0x3] }
 0x33b   :  { %v2006_v17 = vld.sshfl [vmem:[#allocation1 + $0x20] sm:$0xff pattern:$0x73625140]  ;;  %2010 = vst [vmem:[#allocation1 + $0x3] ss:$4 sm:$0xff] %v1809_v21 }
 0x33c   :  { %2011 = vst [vmem:[#allocation1 + $0x20] ss:$4 sm:$0xff] %v1810_v23  ;;  %v2351_v28 = vpack.c.bf16 %v2006_v17, %v2005_v16  ;;  %v3914_v16 = vld [vmem:[%s4822_s8 + $0x1b8] sm:$0xff]  ;;  %v3913_v23 = vld [vmem:[%s4822_s8 + $0x1b0] sm:$0xff]  ;;  %v1840_v17 = vld [vmem:[#allocation3 + $0x34] sm:$0x3] }
 0x33d   :  { %2012 = vst [vmem:[#allocation1 + $0x21] ss:$4 sm:$0xff] %v1811_v25  ;;  %3031 = vmatpush.bf16.msrb.mxu2 %v3891_v11  ;;  %3062 = vmatpush.bf16.msra.mxu0 %v3914_v16  ;;  %v1841_v25 = vld [vmem:[#allocation3 + $0x38] sm:$0x3]  ;;  %v3918_v11 = vld [vmem:[%s4822_s8 + $0x1d8] sm:$0xff] }
 0x33e   :  { %2013 = vst [vmem:[#allocation1 + $0x22] ss:$4 sm:$0xff] %v1812_v30  ;;  %2975 = vmatmul.bf16.vlgmr.msra.gmra.mxu3 %v2351_v28  ;;  %v1842_v28 = vld [vmem:[#allocation3 + $0x3c] sm:$0x3] }
 0x33f   :  { %2014 = vst [vmem:[#allocation1 + $0x23] ss:$4 sm:$0xff] %v1813_v15  ;;  %3046 = vmatpush.bf16.msrb.mxu3 %v3903_v14  ;;  %v3912_v15 = vld [vmem:[%s4822_s8 + $0x1a8] sm:$0xff] }
 0x341   :  { %3063 = vmatpush.bf16.msra.mxu0 %v3913_v23 }
 0x342   :  { %v2015_v38 = vld.sshfl [vmem:[#allocation1] sm:$0xff pattern:$0x73625140] }
 0x343   :  { %2037 = vst [vmem:[#allocation1] ss:$4 sm:$0xff] %v1814_v37  ;;  %3047 = vmatpush.bf16.msrb.mxu3 %v3902_v44  ;;  %v3900_v37 = vld [vmem:[%s4822_s8 + $0x148] sm:$0xff]  ;;  %v3917_v44 = vld [vmem:[%s4822_s8 + $0x1d0] sm:$0xff] }
 0x344   :  { %2039 = vst [vmem:[#allocation1 + $0x1] ss:$4 sm:$0xff] %v1815_v27  ;;  %v3899_v27 = vld [vmem:[%s4822_s8 + $0x140] sm:$0xff] }
 0x345   :  { %2041 = vst [vmem:[#allocation1 + $0x2] ss:$4 sm:$0xff] %v1816_v42  ;;  %3064 = vmatpush.bf16.msra.mxu0 %v3912_v15  ;;  %v1846_v42 = vld [vmem:[#allocation3 + $0x5] sm:$0x3] }
 0x346   :  { %v2016_v43 = vld.sshfl [vmem:[#allocation1 + $0x20] sm:$0xff pattern:$0x73625140]  ;;  %2043 = vst [vmem:[#allocation1 + $0x3] ss:$4 sm:$0xff] %v1817_v29 }
 0x347   :  { %2045 = vst [vmem:[#allocation1 + $0x20] ss:$4 sm:$0xff] %v1818_v32  ;;  %v2360_v47 = vpack.c.bf16 %v2016_v43, %v2015_v38  ;;  %3048 = vmatpush.bf16.msrb.mxu3 %v3901_v10  ;;  %v1844_v38 = vld [vmem:[#allocation3 + $0x44] sm:$0x3]  ;;  %v1847_v32 = vld [vmem:[#allocation3 + $0x9] sm:$0x3] }
 0x348   :  { %2047 = vst [vmem:[#allocation1 + $0x21] ss:$4 sm:$0xff] %v1819_v39  ;;  %v1848_v43 = vld [vmem:[#allocation3 + $0xd] sm:$0x3]  ;;  %v1850_v39 = vld [vmem:[#allocation3 + $0x15] sm:$0x3] }
 0x349   :  { %2049 = vst [vmem:[#allocation1 + $0x22] ss:$4 sm:$0xff] %v1820_v12  ;;  %3065 = vmatpush.bf16.msra.mxu0 %v3911_v22  ;;  %v1852_v12 = vld [vmem:[#allocation3 + $0x1d] sm:$0x3]  ;;  %v3928_v10 = vld [vmem:[%s4822_s8 + $0x228] sm:$0xff] }
 0x34a   :  { %2051 = vst [vmem:[#allocation1 + $0x23] ss:$4 sm:$0xff] %v1821_v33  ;;  %v1853_v33 = vld [vmem:[#allocation3 + $0x21] sm:$0x3] }
 0x34b   :  { %3049 = vmatpush.bf16.msrb.mxu3 %v3900_v37  ;;  %v3915_v37 = vld [vmem:[%s4822_s8 + $0x1c0] sm:$0xff] }
 0x34d   :  { %v2052_v48 = vld.sshfl [vmem:[#allocation1] sm:$0xff pattern:$0x73625140]  ;;  %3066 = vmatpush.bf16.msra.mxu0 %v3910_v19 }
 0x34e   :  { %2054 = vst [vmem:[#allocation1] ss:$4 sm:$0xff] %v1822_v46  ;;  %2980 = vmatmul.bf16.gmra.mxu3 %v2360_v47  ;;  %v1854_v46 = vld [vmem:[#allocation3 + $0x2d] sm:$0x3] }
 0x34f   :  { %2055 = vst [vmem:[#allocation1 + $0x1] ss:$4 sm:$0xff] %v1823_v50  ;;  %3050 = vmatpush.bf16.msrb.mxu3 %v3899_v27  ;;  %v3909_v50 = vld [vmem:[%s4822_s8 + $0x190] sm:$0xff]  ;;  %v1881_v27 = vld [vmem:[#allocation3 + $0x10] sm:$0x3] }
 0x350   :  { %2056 = vst [vmem:[#allocation1 + $0x2] ss:$4 sm:$0xff] %v1824_v52  ;;  %v1856_v52 = vld [vmem:[#allocation3 + $0x35] sm:$0x3] }
 0x351   :  { %v2053_v55 = vld.sshfl [vmem:[#allocation1 + $0x20] sm:$0xff pattern:$0x73625140]  ;;  %2057 = vst [vmem:[#allocation1 + $0x3] ss:$4 sm:$0xff] %v1825_v54  ;;  %3067 = vmatpush.bf16.msra.mxu0 %v3909_v50 }
 0x352   :  { %2058 = vst [vmem:[#allocation1 + $0x20] ss:$4 sm:$0xff] %v1826_v53  ;;  %v2352_v56 = vpack.c.bf16 %v2053_v55, %v2052_v48  ;;  %v1857_v54 = vld [vmem:[#allocation3 + $0x39] sm:$0x3]  ;;  %v1858_v53 = vld [vmem:[#allocation3 + $0x3d] sm:$0x3] }
 0x353   :  { %2059 = vst [vmem:[#allocation1 + $0x21] ss:$4 sm:$0xff] %v1827_v7  ;;  %3931 = vmatpush.bf16.msra.mxu3 %v3914_v16  ;;  %v3908_v55 = vld [vmem:[%s4822_s8 + $0x188] sm:$0xff]  ;;  %v1870_v16 = vld [vmem:[#allocation3 + $0x2e] sm:$0x3] }
 0x354   :  { %2060 = vst [vmem:[#allocation1 + $0x22] ss:$4 sm:$0xff] %v1828_v59  ;;  %2994 = vmatmul.bf16.vlgmr.msrb.gmra.mxu0 %v2352_v56  ;;  %v3920_v56 = vld [vmem:[%s4822_s8 + $0x1e8] sm:$0xff]  ;;  %v1860_v59 = vld [vmem:[#allocation3 + $0x45] sm:$0x3] }
 0x355   :  { %2061 = vst [vmem:[#allocation1 + $0x23] ss:$4 sm:$0xff] %v1829_v61  ;;  %v1861_v61 = vld [vmem:[#allocation3 + $0x49] sm:$0x3]  ;;  %3068 = vmatpush.bf16.msra.mxu0 %v3908_v55  ;;  %3083 = vmatpush.bf16.msra.mxu1 %v3920_v56 }
 0x357   :  { %3932 = vmatpush.bf16.msra.mxu3 %v3913_v23  ;;  %v1873_v23 = vld [vmem:[#allocation3 + $0x3a] sm:$0x3] }
 0x358   :  { %v2062_v36 = vld.sshfl [vmem:[#allocation1] sm:$0xff pattern:$0x73625140] }
 0x359   :  { %2084 = vst [vmem:[#allocation1] ss:$4 sm:$0xff] %v1830_v63  ;;  %v1862_v63 = vld [vmem:[#allocation3 + $0x6] sm:$0x3]  ;;  %3069 = vmatpush.bf16.msra.mxu0 %v3907_v26  ;;  %3084 = vmatpush.bf16.msra.mxu1 %v3919_v62  ;;  %v1900_v62 = vld [vmem:[#allocation3 + $0x1d] sm:$0x3] }
 0x35a   :  { %2086 = vst [vmem:[#allocation1 + $0x1] ss:$4 sm:$0xff] %v1831_v0  ;;  %v1863_v0 = vld [vmem:[#allocation3 + $0xa] sm:$0x3] }
 0x35b   :  { %2088 = vst [vmem:[#allocation1 + $0x2] ss:$4 sm:$0xff] %v1832_v60  ;;  %3933 = vmatpush.bf16.msra.mxu3 %v3912_v15  ;;  %v1864_v60 = vld [vmem:[#allocation3 + $0xe] sm:$0x3]  ;;  %v1876_v15 = vld [vmem:[#allocation3 + $0x46] sm:$0x3] }
 0x35c   :  { %v2063_v5 = vld.sshfl [vmem:[#allocation1 + $0x20] sm:$0xff pattern:$0x73625140]  ;;  %2090 = vst [vmem:[#allocation1 + $0x3] ss:$4 sm:$0xff] %v1833_v3 }
 0x35d   :  { %2092 = vst [vmem:[#allocation1 + $0x20] ss:$4 sm:$0xff] %v1834_v4  ;;  %v2361_v18 = vpack.c.bf16 %v2063_v5, %v2062_v36  ;;  %v1867_v4 = vld [vmem:[#allocation3 + $0x1a] sm:$0x3]  ;;  %v1868_v5 = vld [vmem:[#allocation3 + $0x1e] sm:$0x3]  ;;  %3085 = vmatpush.bf16.msra.mxu1 %v3918_v11 }
 0x35e   :  { %2094 = vst [vmem:[#allocation1 + $0x21] ss:$4 sm:$0xff] %v1835_v9  ;;  %v1869_v9 = vld [vmem:[#allocation3 + $0x22] sm:$0x3] }
 0x35f   :  { %2096 = vst [vmem:[#allocation1 + $0x22] ss:$4 sm:$0xff] %v1836_v13  ;;  %3934 = vmatpush.bf16.msra.mxu3 %v3911_v22  ;;  %v3930_v13 = vld [vmem:[%s4822_s8 + $0x238] sm:$0xff]  ;;  %v1880_v22 = vld [vmem:[#allocation3 + $0xc] sm:$0x3] }
 0x360   :  { %2098 = vst [vmem:[#allocation1 + $0x23] ss:$4 sm:$0xff] %v1837_v41  ;;  %3100 = vmatpush.bf16.msra.mxu2 %v3930_v13  ;;  %v3929_v41 = vld [vmem:[%s4822_s8 + $0x230] sm:$0xff]  ;;  %v1908_v13 = vld [vmem:[#allocation3 + $0x45] sm:$0x3] }
 0x361   :  { %3086 = vmatpush.bf16.msra.mxu1 %v3917_v44  ;;  %v1911_v44 = vld [vmem:[#allocation3 + $0xa] sm:$0x3] }
 0x363   :  { %v2099_v21 = vld.sshfl [vmem:[#allocation1] sm:$0xff pattern:$0x73625140]  ;;  %3935 = vmatpush.bf16.msra.mxu3 %v3910_v19 }
 0x364   :  { %2101 = vst [vmem:[#allocation1] ss:$4 sm:$0xff] %v1838_v20  ;;  %2999 = vmatmul.bf16.gmra.mxu0 %v2361_v18  ;;  %v1871_v20 = vld [vmem:[#allocation3 + $0x32] sm:$0x3]  ;;  %3101 = vmatpush.bf16.msra.mxu2 %v3929_v41  ;;  %v1909_v41 = vld [vmem:[#allocation3 + $0x49] sm:$0x3] }
 0x365   :  { %2102 = vst [vmem:[#allocation1 + $0x1] ss:$4 sm:$0xff] %v1839_v24  ;;  %v1874_v24 = vld [vmem:[#allocation3 + $0x3e] sm:$0x3] }
 0x366   :  { %2103 = vst [vmem:[#allocation1 + $0x2] ss:$4 sm:$0xff] %v1840_v17 }
 0x367   :  { %v2100_v30 = vld.sshfl [vmem:[#allocation1 + $0x20] sm:$0xff pattern:$0x73625140]  ;;  %2104 = vst [vmem:[#allocation1 + $0x3] ss:$4 sm:$0xff] %v1841_v25  ;;  %3936 = vmatpush.bf16.msra.mxu3 %v3909_v50  ;;  %v3916_v25 = vld [vmem:[%s4822_s8 + $0x1c8] sm:$0xff] }
 0x368   :  { %2105 = vst [vmem:[#allocation1 + $0x20] ss:$4 sm:$0xff] %v1842_v28  ;;  %v2353_v35 = vpack.c.bf16 %v2100_v30, %v2099_v21  ;;  %v1872_v21 = vld [vmem:[#allocation3 + $0x36] sm:$0x3]  ;;  %v1875_v28 = vld [vmem:[#allocation3 + $0x42] sm:$0x3]  ;;  %3102 = vmatpush.bf16.msra.mxu2 %v3928_v10  ;;  %3087 = vmatpush.bf16.msra.mxu1 %v3916_v25 }
 0x369   :  { %2106 = vst [vmem:[#allocation1 + $0x21] ss:$4 sm:$0xff] %v1843_v31  ;;  %v1877_v31 = vld [vmem:[#allocation3 + $0x4a] sm:$0x3]  ;;  %v3924_v50 = vld [vmem:[%s4822_s8 + $0x208] sm:$0xff] }
 0x36a   :  { %2107 = vst [vmem:[#allocation1 + $0x22] ss:$4 sm:$0xff] %v1844_v38  ;;  %3013 = vmatmul.bf16.vlgmr.msrb.gmra.mxu1 %v2353_v35  ;;  %v3927_v35 = vld [vmem:[%s4822_s8 + $0x220] sm:$0xff]  ;;  %v1916_v10 = vld [vmem:[#allocation3 + $0x1e] sm:$0x3] }
 0x36b   :  { %2108 = vst [vmem:[#allocation1 + $0x23] ss:$4 sm:$0xff] %v1845_v40  ;;  %3937 = vmatpush.bf16.msra.mxu3 %v3908_v55  ;;  %v1879_v38 = vld [vmem:[#allocation3 + $0x8] sm:$0x3]  ;;  %v1917_v25 = vld [vmem:[#allocation3 + $0x22] sm:$0x3] }
 0x36c   :  { %3103 = vmatpush.bf16.msra.mxu2 %v3927_v35  ;;  %3088 = vmatpush.bf16.msra.mxu1 %v3915_v37  ;;  %v3923_v55 = vld [vmem:[%s4822_s8 + $0x200] sm:$0xff]  ;;  %v1921_v35 = vld [vmem:[#allocation3 + $0x3a] sm:$0x3]  ;;  %v1922_v37 = vld [vmem:[#allocation3 + $0x3e] sm:$0x3] }
 0x36e   :  { %v2109_v29 = vld.sshfl [vmem:[#allocation1] sm:$0xff pattern:$0x73625140] }
 0x36f   :  { %2131 = vst [vmem:[#allocation1] ss:$4 sm:$0xff] %v1846_v42  ;;  %3938 = vmatpush.bf16.msra.mxu3 %v3907_v26  ;;  %v1882_v42 = vld [vmem:[#allocation3 + $0x14] sm:$0x3] }
 0x370   :  { %2133 = vst [vmem:[#allocation1 + $0x1] ss:$4 sm:$0xff] %v1847_v32 }
 0x371   :  { %2135 = vst [vmem:[#allocation1 + $0x2] ss:$4 sm:$0xff] %v1848_v43  ;;  %v1884_v43 = vld [vmem:[#allocation3 + $0x1c] sm:$0x3] }
 0x372   :  { %v2110_v45 = vld.sshfl [vmem:[#allocation1 + $0x20] sm:$0xff pattern:$0x73625140]  ;;  %2137 = vst [vmem:[#allocation1 + $0x3] ss:$4 sm:$0xff] %v1849_v34 }
 0x373   :  { %2139 = vst [vmem:[#allocation1 + $0x20] ss:$4 sm:$0xff] %v1850_v39  ;;  %v2362_v47 = vpack.c.bf16 %v2110_v45, %v2109_v29  ;;  %v1883_v29 = vld [vmem:[#allocation3 + $0x18] sm:$0x3]  ;;  %v1886_v34 = vld [vmem:[#allocation3 + $0x24] sm:$0x3] }
 0x374   :  { %2141 = vst [vmem:[#allocation1 + $0x21] ss:$4 sm:$0xff] %v1851_v6  ;;  %v1885_v39 = vld [vmem:[#allocation3 + $0x20] sm:$0x3] }
 0x375   :  { %2143 = vst [vmem:[#allocation1 + $0x22] ss:$4 sm:$0xff] %v1852_v12  ;;  %v3926_v45 = vld [vmem:[%s4822_s8 + $0x218] sm:$0xff]  ;;  %v3925_v12 = vld [vmem:[%s4822_s8 + $0x210] sm:$0xff] }
 0x376   :  { %2145 = vst [vmem:[#allocation1 + $0x23] ss:$4 sm:$0xff] %v1853_v33  ;;  %3104 = vmatpush.bf16.msra.mxu2 %v3926_v45  ;;  %v1887_v33 = vld [vmem:[#allocation3 + $0x30] sm:$0x3] }
 0x379   :  { %v2146_v48 = vld.sshfl [vmem:[#allocation1] sm:$0xff pattern:$0x73625140] }
 0x37a   :  { %2148 = vst [vmem:[#allocation1] ss:$4 sm:$0xff] %v1854_v46  ;;  %3018 = vmatmul.bf16.gmra.mxu1 %v2362_v47  ;;  %v1889_v46 = vld [vmem:[#allocation3 + $0x38] sm:$0x3]  ;;  %v1890_v47 = vld [vmem:[#allocation3 + $0x3c] sm:$0x3]  ;;  %3105 = vmatpush.bf16.msra.mxu2 %v3925_v12 }
 0x37b   :  { %2149 = vst [vmem:[#allocation1 + $0x1] ss:$4 sm:$0xff] %v1855_v51  ;;  %v1892_v51 = vld [vmem:[#allocation3 + $0x44] sm:$0x3] }
 0x37c   :  { %2150 = vst [vmem:[#allocation1 + $0x2] ss:$4 sm:$0xff] %v1856_v52 }
 0x37d   :  { %v2147_v7 = vld.sshfl [vmem:[#allocation1 + $0x20] sm:$0xff pattern:$0x73625140]  ;;  %2151 = vst [vmem:[#allocation1 + $0x3] ss:$4 sm:$0xff] %v1857_v54 }
 0x37e   :  { %2152 = vst [vmem:[#allocation1 + $0x20] ss:$4 sm:$0xff] %v1858_v53  ;;  %v2354_v58 = vpack.c.bf16 %v2147_v7, %v2146_v48  ;;  %v1891_v48 = vld [vmem:[#allocation3 + $0x40] sm:$0x3]  ;;  %v1894_v54 = vld [vmem:[#allocation3 + $0x4c] sm:$0x3]  ;;  %3106 = vmatpush.bf16.msra.mxu2 %v3924_v50 }
 0x37f   :  { %2153 = vst [vmem:[#allocation1 + $0x21] ss:$4 sm:$0xff] %v1859_v57  ;;  %v1893_v53 = vld [vmem:[#allocation3 + $0x48] sm:$0x3]  ;;  %v1896_v57 = vld [vmem:[#allocation3 + $0xd] sm:$0x3] }
 0x380   :  { %2154 = vst [vmem:[#allocation1 + $0x22] ss:$4 sm:$0xff] %v1860_v59  ;;  %3032 = vmatmul.bf16.vlgmr.msrb.gmra.mxu2 %v2354_v58  ;;  %v1895_v7 = vld [vmem:[#allocation3 + $0x9] sm:$0x3]  ;;  %v1897_v58 = vld [vmem:[#allocation3 + $0x11] sm:$0x3] }
 0x381   :  { %2155 = vst [vmem:[#allocation1 + $0x23] ss:$4 sm:$0xff] %v1861_v61  ;;  %v1898_v59 = vld [vmem:[#allocation3 + $0x15] sm:$0x3]  ;;  %v1899_v61 = vld [vmem:[#allocation3 + $0x19] sm:$0x3] }
 0x382   :  { %3107 = vmatpush.bf16.msra.mxu2 %v3923_v55 }
 0x384   :  { %v2156_v36 = vld.sshfl [vmem:[#allocation1] sm:$0xff pattern:$0x73625140] }
 0x385   :  { %2178 = vst [vmem:[#allocation1] ss:$4 sm:$0xff] %v1862_v63 }
 0x386   :  { %2180 = vst [vmem:[#allocation1 + $0x1] ss:$4 sm:$0xff] %v1863_v0  ;;  %v1901_v0 = vld [vmem:[#allocation3 + $0x21] sm:$0x3] }
 0x387   :  { %2182 = vst [vmem:[#allocation1 + $0x2] ss:$4 sm:$0xff] %v1864_v60  ;;  %v1903_v60 = vld [vmem:[#allocation3 + $0x31] sm:$0x3] }
 0x388   :  { %v2157_v3 = vld.sshfl [vmem:[#allocation1 + $0x20] sm:$0xff pattern:$0x73625140]  ;;  %2184 = vst [vmem:[#allocation1 + $0x3] ss:$4 sm:$0xff] %v1865_v2 }
 0x389   :  { %2186 = vst [vmem:[#allocation1 + $0x20] ss:$4 sm:$0xff] %v1866_v1  ;;  %v2363_v14 = vpack.c.bf16 %v2157_v3, %v2156_v36  ;;  %v1902_v36 = vld [vmem:[#allocation3 + $0x25] sm:$0x3]  ;;  %v1904_v1 = vld [vmem:[#allocation3 + $0x35] sm:$0x3] }
 0x38a   :  { %2188 = vst [vmem:[#allocation1 + $0x21] ss:$4 sm:$0xff] %v1867_v4  ;;  %v1905_v3 = vld [vmem:[#allocation3 + $0x39] sm:$0x3]  ;;  %v1906_v4 = vld [vmem:[#allocation3 + $0x3d] sm:$0x3] }
 0x38b   :  { %2190 = vst [vmem:[#allocation1 + $0x22] ss:$4 sm:$0xff] %v1868_v5  ;;  %v1907_v5 = vld [vmem:[#allocation3 + $0x41] sm:$0x3] }
 0x38c   :  { %2192 = vst [vmem:[#allocation1 + $0x23] ss:$4 sm:$0xff] %v1869_v9 }
 0x38f   :  { %v2193_v18 = vld.sshfl [vmem:[#allocation1] sm:$0xff pattern:$0x73625140] }
 0x390   :  { %3037 = vmatmul.bf16.gmra.mxu2 %v2363_v14  ;;  %2195 = vst [vmem:[#allocation1] ss:$4 sm:$0xff] %v1870_v16  ;;  %v1910_v14 = vld [vmem:[#allocation3 + $0x4d] sm:$0x3] }
 0x391   :  { %2196 = vst [vmem:[#allocation1 + $0x1] ss:$4 sm:$0xff] %v1871_v20  ;;  %v1913_v20 = vld [vmem:[#allocation3 + $0x12] sm:$0x3] }
 0x392   :  { %2197 = vst [vmem:[#allocation1 + $0x2] ss:$4 sm:$0xff] %v1872_v21  ;;  %v1914_v21 = vld [vmem:[#allocation3 + $0x16] sm:$0x3] }
 0x393   :  { %v2194_v17 = vld.sshfl [vmem:[#allocation1 + $0x20] sm:$0xff pattern:$0x73625140]  ;;  %2198 = vst [vmem:[#allocation1 + $0x3] ss:$4 sm:$0xff] %v1873_v23 }
 0x394   :  { %v2355_v30 = vpack.c.bf16 %v2194_v17, %v2193_v18  ;;  %2199 = vst [vmem:[#allocation1 + $0x20] ss:$4 sm:$0xff] %v1874_v24  ;;  %v1912_v18 = vld [vmem:[#allocation3 + $0xe] sm:$0x3]  ;;  %v1915_v23 = vld [vmem:[#allocation3 + $0x1a] sm:$0x3] }
 0x395   :  { %2200 = vst [vmem:[#allocation1 + $0x21] ss:$4 sm:$0xff] %v1875_v28  ;;  %v1918_v17 = vld [vmem:[#allocation3 + $0x26] sm:$0x3] }
 0x396   :  { %3051 = vmatmul.bf16.vlgmr.msrb.gmra.mxu3 %v2355_v30  ;;  %2201 = vst [vmem:[#allocation1 + $0x22] ss:$4 sm:$0xff] %v1876_v15  ;;  %v1919_v30 = vld [vmem:[#allocation3 + $0x32] sm:$0x3] }
 0x397   :  { %2202 = vst [vmem:[#allocation1 + $0x23] ss:$4 sm:$0xff] %v1877_v31  ;;  %v1920_v31 = vld [vmem:[#allocation3 + $0x36] sm:$0x3] }
 0x39a   :  { %v2203_v40 = vld.sshfl [vmem:[#allocation1] sm:$0xff pattern:$0x73625140] }
 0x39b   :  { %2225 = vst [vmem:[#allocation1] ss:$4 sm:$0xff] %v1879_v38  ;;  %v1923_v38 = vld [vmem:[#allocation3 + $0x42] sm:$0x3] }
 0x39c   :  { %2227 = vst [vmem:[#allocation1 + $0x1] ss:$4 sm:$0xff] %v1880_v22  ;;  %v1924_v22 = vld [vmem:[#allocation3 + $0x46] sm:$0x3] }
 0x39d   :  { %2229 = vst [vmem:[#allocation1 + $0x2] ss:$4 sm:$0xff] %v1881_v27 }
 0x39e   :  { %v2204_v32 = vld.sshfl [vmem:[#allocation1 + $0x20] sm:$0xff pattern:$0x73625140]  ;;  %2231 = vst [vmem:[#allocation1 + $0x3] ss:$4 sm:$0xff] %v1882_v42 }
 0x39f   :  { %2233 = vst [vmem:[#allocation1 + $0x20] ss:$4 sm:$0xff] %v1883_v29  ;;  %v2364_v6 = vpack.c.bf16 %v2204_v32, %v2203_v40  ;;  %v1926_v42 = vld [vmem:[#allocation3 + $0x4e] sm:$0x3]  ;;  %v1925_v29 = vld [vmem:[#allocation3 + $0x4a] sm:$0x3] }
 0x3a0   :  { %2235 = vst [vmem:[#allocation1 + $0x21] ss:$4 sm:$0xff] %v1884_v43 }
 0x3a1   :  { %2237 = vst [vmem:[#allocation1 + $0x22] ss:$4 sm:$0xff] %v1885_v39 }
 0x3a2   :  { %2239 = vst [vmem:[#allocation1 + $0x23] ss:$4 sm:$0xff] %v1886_v34 }
 0x3a5   :  { %v2240_v19 = vld.sshfl [vmem:[#allocation1] sm:$0xff pattern:$0x73625140] }
 0x3a6   :  { %3056 = vmatmul.bf16.gmra.mxu3 %v2364_v6  ;;  %2242 = vst [vmem:[#allocation1] ss:$4 sm:$0xff] %v1887_v33 }
 0x3a7   :  { %2243 = vst [vmem:[#allocation1 + $0x1] ss:$4 sm:$0xff] %v1888_v8 }
 0x3a8   :  { %2244 = vst [vmem:[#allocation1 + $0x2] ss:$4 sm:$0xff] %v1889_v46 }
 0x3a9   :  { %v2241_v49 = vld.sshfl [vmem:[#allocation1 + $0x20] sm:$0xff pattern:$0x73625140]  ;;  %2245 = vst [vmem:[#allocation1 + $0x3] ss:$4 sm:$0xff] %v1890_v47 }
 0x3aa   :  { %v2356_v52 = vpack.c.bf16 %v2241_v49, %v2240_v19  ;;  %2246 = vst [vmem:[#allocation1 + $0x20] ss:$4 sm:$0xff] %v1891_v48 }
 0x3ab   :  { %2247 = vst [vmem:[#allocation1 + $0x21] ss:$4 sm:$0xff] %v1892_v51  ;;  %v2957_v39 = vpop.f32.mrf.mxu2 }
 0x3ac   :  { %3070 = vmatmul.bf16.vlgmr.msra.gmra.mxu0 %v2356_v52  ;;  %2248 = vst [vmem:[#allocation1 + $0x22] ss:$4 sm:$0xff] %v1893_v53 }
 0x3ad   :  { %2249 = vst [vmem:[#allocation1 + $0x23] ss:$4 sm:$0xff] %v1894_v54 }
 0x3b0   :  { %v2250_v56 = vld.sshfl [vmem:[#allocation1] sm:$0xff pattern:$0x73625140] }
 0x3b1   :  { %2272 = vst [vmem:[#allocation1] ss:$4 sm:$0xff] %v1895_v7 }
 0x3b2   :  { %2274 = vst [vmem:[#allocation1 + $0x1] ss:$4 sm:$0xff] %v1896_v57 }
 0x3b3   :  { %2276 = vst [vmem:[#allocation1 + $0x2] ss:$4 sm:$0xff] %v1897_v58  ;;  %v2959_v6 = vpop.f32.mrf.mxu2 }
 0x3b4   :  { %v2251_v26 = vld.sshfl [vmem:[#allocation1 + $0x20] sm:$0xff pattern:$0x73625140]  ;;  %2278 = vst [vmem:[#allocation1 + $0x3] ss:$4 sm:$0xff] %v1898_v59 }
 0x3b5   :  { %v2365_v63 = vpack.c.bf16 %v2251_v26, %v2250_v56  ;;  %2280 = vst [vmem:[#allocation1 + $0x20] ss:$4 sm:$0xff] %v1899_v61  ;;  %v3986_v56 = vld [vmem:[%s4823_s9] ss:$0 sm:$0xff] }
 0x3b6   :  { %2282 = vst [vmem:[#allocation1 + $0x21] ss:$4 sm:$0xff] %v1900_v62  ;;  %v2958_v61 = vadd.f32 %v3986_v56, %v2957_v39 }
 0x3b7   :  { %3075 = vmatmul.bf16.vlgmr.msra.gmra.mxu3 %v2365_v63  ;;  %2284 = vst [vmem:[#allocation1 + $0x22] ss:$4 sm:$0xff] %v1901_v0 }
 0x3b8   :  { %2286 = vst [vmem:[#allocation1 + $0x23] ss:$4 sm:$0xff] %v1902_v36 }
 0x3bb   :  { %v2287_v2 = vld.sshfl [vmem:[#allocation1] sm:$0xff pattern:$0x73625140]  ;;  %v2962_v33 = vpop.f32.mrf.mxu2 }
 0x3bc   :  { %2289 = vst [vmem:[#allocation1] ss:$4 sm:$0xff] %v1903_v60 }
 0x3bd   :  { %2290 = vst [vmem:[#allocation1 + $0x1] ss:$4 sm:$0xff] %v1904_v1  ;;  %v2960_v1 = vadd.f32 %v3986_v56, %v2959_v6 }
 0x3be   :  { %2291 = vst [vmem:[#allocation1 + $0x2] ss:$4 sm:$0xff] %v1905_v3 }
 0x3bf   :  { %v2288_v9 = vld.sshfl [vmem:[#allocation1 + $0x20] sm:$0xff pattern:$0x73625140]  ;;  %2292 = vst [vmem:[#allocation1 + $0x3] ss:$4 sm:$0xff] %v1906_v4 }
 0x3c0   :  { %v2357_v11 = vpack.c.bf16 %v2288_v9, %v2287_v2  ;;  %2293 = vst [vmem:[#allocation1 + $0x20] ss:$4 sm:$0xff] %v1907_v5 }
 0x3c1   :  { %2294 = vst [vmem:[#allocation1 + $0x21] ss:$4 sm:$0xff] %v1908_v13  ;;  %v2976_v45 = vpop.f32.mrf.mxu3 }
 0x3c2   :  { %3089 = vmatmul.bf16.vlgmr.msra.gmra.mxu1 %v2357_v11  ;;  %2295 = vst [vmem:[#allocation1 + $0x22] ss:$4 sm:$0xff] %v1909_v41  ;;  %v2977_v26 = vadd.f32 %v2976_v45, %v2958_v61 }
 0x3c3   :  { %2296 = vst [vmem:[#allocation1 + $0x23] ss:$4 sm:$0xff] %v1910_v14  ;;  %v2964_v46 = vpop.f32.mrf.mxu2 }
 0x3c6   :  { %v2297_v16 = vld.sshfl [vmem:[#allocation1] sm:$0xff pattern:$0x73625140] }
 0x3c7   :  { %2319 = vst [vmem:[#allocation1] ss:$4 sm:$0xff] %v1911_v44  ;;  %v3987_v44 = vld [vmem:[%s4824_s10] ss:$0 sm:$0xff]  ;;  %s4023_s10 = smov [#allocation4]  }
 0x3c8   :  { %2321 = vst [vmem:[#allocation1 + $0x1] ss:$4 sm:$0xff] %v1912_v18  ;;  %s3143_s13 = sshll.u32 %s4023_s10, 4  ;;  %s3144_s13 = int_to_ptr.vmem [resolvable:$true] %s3143_s13 }
 0x3c9   :  { %2323 = vst [vmem:[#allocation1 + $0x2] ss:$4 sm:$0xff] %v1913_v20  ;;  %v2978_v12 = vpop.f32.mrf.mxu3  ;;  %v2963_v20 = vadd.f32 %v3986_v56, %v2962_v33 }
 0x3ca   :  { %v2298_v24 = vld.sshfl [vmem:[#allocation1 + $0x20] sm:$0xff pattern:$0x73625140]  ;;  %2325 = vst [vmem:[#allocation1 + $0x3] ss:$4 sm:$0xff] %v1914_v21  ;;  %v2979_v4 = vadd.f32 %v2978_v12, %v2960_v1 }
 0x3cb   :  { %2327 = vst [vmem:[#allocation1 + $0x20] ss:$4 sm:$0xff] %v1915_v23  ;;  %v2366_v28 = vpack.c.bf16 %v2298_v24, %v2297_v16 }
 0x3cc   :  { %2329 = vst [vmem:[#allocation1 + $0x21] ss:$4 sm:$0xff] %v1916_v10 }
 0x3cd   :  { %2331 = vst [vmem:[#allocation1 + $0x22] ss:$4 sm:$0xff] %v1917_v25 }
 0x3ce   :  { %2333 = vst [vmem:[#allocation1 + $0x23] ss:$4 sm:$0xff] %v1918_v17 }
 0x3d1   :  { %v2334_v15 = vld.sshfl [vmem:[#allocation1] sm:$0xff pattern:$0x73625140]  ;;  %v2981_v19 = vpop.f32.mrf.mxu3  ;;  %v2995_v47 = vpop.f32.mrf.mxu0 }
 0x3d2   :  { %3094 = vmatmul.bf16.gmra.mxu1 %v2366_v28  ;;  %2336 = vst [vmem:[#allocation1] ss:$4 sm:$0xff] %v1919_v30  ;;  %v2996_v63 = vadd.f32 %v2995_v47, %v2977_v26  ;;  %v2982_v10 = vadd.f32 %v2981_v19, %v2963_v20 }
 0x3d3   :  { %2337 = vst [vmem:[#allocation1 + $0x1] ss:$4 sm:$0xff] %v1920_v31 }
 0x3d4   :  { %2338 = vst [vmem:[#allocation1 + $0x2] ss:$4 sm:$0xff] %v1921_v35 }
 0x3d5   :  { %v2335_v40 = vld.sshfl [vmem:[#allocation1 + $0x20] sm:$0xff pattern:$0x73625140]  ;;  %2339 = vst [vmem:[#allocation1 + $0x3] ss:$4 sm:$0xff] %v1922_v37 }
 0x3d6   :  { %v2358_v27 = vpack.c.bf16 %v2335_v40, %v2334_v15  ;;  %2340 = vst [vmem:[#allocation1 + $0x20] ss:$4 sm:$0xff] %v1923_v38  ;;  %v2965_v40 = vadd.f32 %v3986_v56, %v2964_v46 }
 0x3d7   :  { %2341 = vst [vmem:[#allocation1 + $0x21] ss:$4 sm:$0xff] %v1924_v22 }
 0x3d8   :  { %3108 = vmatmul.bf16.vlgmr.msra.gmra.mxu2 %v2358_v27  ;;  %2342 = vst [vmem:[#allocation1 + $0x22] ss:$4 sm:$0xff] %v1925_v29 }
 0x3d9   :  { %2343 = vst [vmem:[#allocation1 + $0x23] ss:$4 sm:$0xff] %v1926_v42  ;;  %v2983_v48 = vpop.f32.mrf.mxu3  ;;  %v2997_v51 = vpop.f32.mrf.mxu0 }
 0x3da   :  { %v2998_v9 = vadd.f32 %v2997_v51, %v2979_v4  ;;  %v2984_v29 = vadd.f32 %v2983_v48, %v2965_v40 }
 0x3dc   :  { %v2344_v32 = vld.sshfl [vmem:[#allocation1] sm:$0xff pattern:$0x73625140] }
 0x3e0   :  { %v2345_v43 = vld.sshfl [vmem:[#allocation1 + $0x20] sm:$0xff pattern:$0x73625140] }
 0x3e1   :  { %v2367_v34 = vpack.c.bf16 %v2345_v43, %v2344_v32  ;;  %v3000_v55 = vpop.f32.mrf.mxu0 }
 0x3e2   :  { %v3001_v28 = vadd.f32 %v3000_v55, %v2982_v10 }
 0x3e7   :  { %v3014_v8 = vpop.f32.mrf.mxu1 }
 0x3e8   :  { %3113 = vmatmul.bf16.gmra.mxu2 %v2367_v34  ;;  %v3015_v0 = vadd.f32 %v3014_v8, %v2996_v63 }
 0x3e9   :  { %v3002_v59 = vpop.f32.mrf.mxu0 }
 0x3ea   :  { %v3003_v34 = vadd.f32 %v3002_v59, %v2984_v29 }
 0x3ef   :  { %v3016_v50 = vpop.f32.mrf.mxu1 }
 0x3f0   :  { %v3017_v14 = vadd.f32 %v3016_v50, %v2998_v9 }
 0x3f7   :  { %v3019_v54 = vpop.f32.mrf.mxu1 }
 0x3f8   :  { %v3020_v31 = vadd.f32 %v3019_v54, %v3001_v28 }
 0x3ff   :  { %v3021_v57 = vpop.f32.mrf.mxu1 }
 0x400   :  { %v3022_v6 = vadd.f32 %v3021_v57, %v3003_v34 }
 0x403   :  { %v3033_v49 = vpop.f32.mrf.mxu2 }
 0x404   :  { %v3034_v3 = vadd.f32 %v3033_v49, %v3015_v0 }
 0x40b   :  { %v3035_v53 = vpop.f32.mrf.mxu2 }
 0x40c   :  { %v3036_v21 = vadd.f32 %v3035_v53, %v3017_v14 }
 0x413   :  { %v3038_v58 = vpop.f32.mrf.mxu2 }
 0x414   :  { %v3039_v22 = vadd.f32 %v3038_v58, %v3020_v31 }
 0x419   :  { %v3052_v52 = vpop.f32.mrf.mxu3 }
 0x41a   :  { %v3053_v5 = vadd.f32 %v3052_v52, %v3034_v3 }
 0x41b   :  { %v3040_v60 = vpop.f32.mrf.mxu2 }
 0x41c   :  { %v3041_v19 = vadd.f32 %v3040_v60, %v3022_v6 }
 0x421   :  { %v3054_v7 = vpop.f32.mrf.mxu3 }
 0x422   :  { %v3055_v17 = vadd.f32 %v3054_v7, %v3036_v21 }
 0x429   :  { %v3057_v62 = vpop.f32.mrf.mxu3  ;;  %v3071_v2 = vpop.f32.mrf.mxu0 }
 0x42a   :  { %v3072_v13 = vadd.f32 %v3071_v2, %v3053_v5  ;;  %v3058_v32 = vadd.f32 %v3057_v62, %v3039_v22 }
 0x431   :  { %v3059_v11 = vpop.f32.mrf.mxu3  ;;  %v3073_v24 = vpop.f32.mrf.mxu0 }
 0x432   :  { %v3074_v30 = vadd.f32 %v3073_v24, %v3055_v17  ;;  %v3060_v50 = vadd.f32 %v3059_v11, %v3041_v19 }
 0x43a   :  { %v3076_v37 = vpop.f32.mrf.mxu3 }
 0x43b   :  { %v3077_v39 = vadd.f32 %v3076_v37, %v3058_v32 }
 0x43f   :  { %v3090_v36 = vpop.f32.mrf.mxu1 }
 0x440   :  { %v3091_v41 = vadd.f32 %v3090_v36, %v3072_v13 }
 0x442   :  { %v3078_v47 = vpop.f32.mrf.mxu3 }
 0x443   :  { %v3079_v51 = vadd.f32 %v3078_v47, %v3060_v50 }
 0x447   :  { %v3092_v16 = vpop.f32.mrf.mxu1 }
 0x448   :  { %v3093_v35 = vadd.f32 %v3092_v16, %v3074_v30 }
 0x44f   :  { %v3095_v42 = vpop.f32.mrf.mxu1 }
 0x450   :  { %v3096_v12 = vadd.f32 %v3095_v42, %v3077_v39 }
 0x457   :  { %v3097_v49 = vpop.f32.mrf.mxu1 }
 0x458   :  { %v3098_v52 = vadd.f32 %v3097_v49, %v3079_v51 }
 0x45b   :  { %v3109_v18 = vpop.f32.mrf.mxu2 }
 0x45c   :  { %v3110_v23 = vadd.f32 %v3109_v18, %v3091_v41 }
 0x45e   :  { %vm3120_vm14 = vcmp.gt.f32.partialorder %v3110_v23, 0.0  ;;  %v3127_v25 = vmul.f32 %v3987_v44, %v3110_v23 }
 0x460   :  { %v3131_v15 = vsel %vm3120_vm14, %v3110_v23, %v3127_v25 }
 0x461   :  { %3135 = vst.msk [vmem:[#allocation4] sm:$0xff] %vm390_vm0, %v3131_v15 }
 0x463   :  { %v3111_v38 = vpop.f32.mrf.mxu2 }
 0x464   :  { %v3112_v27 = vadd.f32 %v3111_v38, %v3093_v35 }
 0x466   :  { %vm3121_vm15 = vcmp.gt.f32.partialorder %v3112_v27, 0.0  ;;  %v3128_v43 = vmul.f32 %v3987_v44, %v3112_v27 }
 0x468   :  { %v3132_v45 = vsel %vm3121_vm15, %v3112_v27, %v3128_v43 }
 0x469   :  { %3136 = vst.msk [vmem:[#allocation4 + $0x8] sm:$0xff] %vm390_vm0, %v3132_v45 }
 0x46b   :  { %v3114_v33 = vpop.f32.mrf.mxu2 }
 0x46c   :  { %v3115_v8 = vadd.f32 %v3114_v33, %v3096_v12 }
 0x46e   :  { %vm3122_vm1 = vcmp.gt.f32.partialorder %v3115_v8, 0.0  ;;  %v3129_v46 = vmul.f32 %v3987_v44, %v3115_v8 }
 0x470   :  { %v3133_v48 = vsel %vm3122_vm1, %v3115_v8, %v3129_v46 }
 0x471   :  { %3137 = vst.msk [vmem:[#allocation4 + $0x10] sm:$0xff] %vm390_vm0, %v3133_v48 }
 0x473   :  { %v3116_v54 = vpop.f32.mrf.mxu2 }
 0x474   :  { %v3117_v53 = vadd.f32 %v3116_v54, %v3098_v52 }
 0x476   :  { %vm3123_vm2 = vcmp.gt.f32.partialorder %v3117_v53, 0.0  ;;  %v3130_v55 = vmul.f32 %v3987_v44, %v3117_v53 }
 0x478   :  { %v3134_v7 = vsel %vm3123_vm2, %v3117_v53, %v3130_v55 }
 0x479   :  { %3138 = vst.msk [vmem:[#allocation4 + $0x18] sm:$0xff] %vm390_vm0, %v3134_v7 }
 0x47a   :  { %3151 = dma.vmem_to_hbm [thread:$0]  %s3144_s13, 512, %s3146_s14, [#allocation5], %s4024_s15, %s4024_s15, %s4025_s16  }
 0x47b   :  { %4018 = dma.done.wait [#allocation5], 512  }
 0x47c   :  { %4019 = vsyncadd [#allocation5], 4294966784 }
 0x47d   :  { %3156 = vsyncpa [#allocation5], 1 }

</bundles_post_ra>
